<compile_context>
chip_gen: v5e
topology: v5e:2x2
jax: 0.10.0
libtpu: 0.0.40
codegen_flags: <defaults>
</compile_context>

<pallas_src>
import math

import jax
import jax.numpy as jnp
import numpy as np
from jax import lax
from jax.experimental import pallas as pl
from jax.experimental.pallas import tpu as pltpu

# ---------------- model config (small, consistent with the module) ----------------
BATCH = 2
SEQ = 8
HIDDEN = 32
NUM_HEADS = 4
HEAD_DIM = HIDDEN // NUM_HEADS
INTER = HIDDEN * 4
LN_EPS = 1e-12


def _layernorm_kernel(v, gamma, beta, eps=LN_EPS):
    u = jnp.mean(v, axis=-1, keepdims=True)
    s = jnp.mean((v - u) ** 2, axis=-1, keepdims=True)
    return gamma * ((v - u) * lax.rsqrt(s + eps)) + beta


def _gelu(v):
    return v * 0.5 * (1.0 + lax.erf(v / math.sqrt(2.0)))


# ------------------------------- Pallas kernel ------------------------------------
def layer_kernel(x_ref, mask_ref, w_ref, vec_ref, out_ref):
    x = x_ref[...]                                   # (B*S, H) flattened activations

    # ---- packed weight slab: [ wqkv (H,3H) | wo (H,H) | w1 (H,4H) | w2^T (H,4H) ] ----
    w = w_ref[...]                                   # (H, 3H + H + 4H + 4H) = (32, 384)
    wqkv = w[:, :3 * HIDDEN]                         # (H, 3H)
    wo = w[:, 3 * HIDDEN:4 * HIDDEN]                 # (H, H)
    w1 = w[:, 4 * HIDDEN:4 * HIDDEN + INTER]         # (H, 4H)
    w2t = w[:, 4 * HIDDEN + INTER:]                  # (H, 4H)  == w2^T

    # ---- packed vectors, rows = [bqkv, b1, bo, ln1_g, ln1_b, b2, ln2_g, ln2_b] ----
    vecs = vec_ref[...]                              # (8, INTER) padded to 128 lanes
    bqkv = vecs[0:1, :3 * HIDDEN]
    b1 = vecs[1:2, :INTER]
    bo = vecs[2:3, :HIDDEN]
    g1 = vecs[3:4, :HIDDEN]
    be1 = vecs[4:5, :HIDDEN]
    b2 = vecs[5:6, :HIDDEN]
    g2 = vecs[6:7, :HIDDEN]
    be2 = vecs[7:8, :HIDDEN]

    # ---- fused Q/K/V projection: one MXU push with a 3H-lane RHS ----
    qkv = jnp.dot(x, wqkv, preferred_element_type=jnp.float32) + bqkv   # (B*S, 3H)

    scale = 1.0 / math.sqrt(HEAD_DIM)
    contract_rhs1 = (((1,), (1,)), ((), ()))         # contract dim1 vs dim1 (no .T)

    ctx_rows = []                                    # per-batch (S, H) head-concat ctx
    probs_rows = []                                  # per-batch (S, NUM_HEADS*S) probs

    for b in range(BATCH):                           # static, unrolled (B=2)
        rs = slice(b * SEQ, (b + 1) * SEQ)
        qkv_b = qkv[rs]                              # (S, 3H)
        # hoisted key-mask broadcast (same additive mask for every query row / head)
        mask_bc = jnp.broadcast_to(mask_ref[b:b + 1, :], (SEQ, SEQ))

        ctx_parts = []
        probs_parts = []
        for h in range(NUM_HEADS):                   # static, unrolled (4 heads)
            qh = qkv_b[:, h * HEAD_DIM:(h + 1) * HEAD_DIM]
            kh = qkv_b[:, HIDDEN + h * HEAD_DIM:HIDDEN + (h + 1) * HEAD_DIM]
            vh = qkv_b[:, 2 * HIDDEN + h * HEAD_DIM:2 * HIDDEN + (h + 1) * HEAD_DIM]

            # scores = qh @ kh^T without materializing the transpose
            scores = lax.dot_general(qh, kh, contract_rhs1,
                                     preferred_element_type=jnp.float32) * scale
            scores = scores + mask_bc                # (S, S)

            m = jnp.max(scores, axis=-1, keepdims=True)
            e = jnp.exp(scores - m)
            denom = jnp.sum(e, axis=-1, keepdims=True)
            probs = e * pl.reciprocal(denom)         # reciprocal on the EUP
            probs_parts.append(probs)

            ctx_parts.append(jnp.dot(probs, vh, preferred_element_type=jnp.float32))

        ctx_rows.append(jnp.concatenate(ctx_parts, axis=-1))       # (S, H)
        probs_rows.append(jnp.concatenate(probs_parts, axis=-1))   # (S, NUM_HEADS*S)

    ctx = jnp.concatenate(ctx_rows, axis=0)          # (B*S, H)
    probs_all = jnp.concatenate(probs_rows, axis=0)  # (B*S, NUM_HEADS*S)

    # ---- single output projection + residual + LayerNorm ----
    attn = jnp.dot(ctx, wo, preferred_element_type=jnp.float32) + bo
    attn_out = _layernorm_kernel(attn + x, g1, be1)

    # ---- feed-forward (dense1 -> gelu -> dense2) + residual + LayerNorm ----
    h1 = jnp.dot(attn_out, w1, preferred_element_type=jnp.float32) + b1
    h1 = _gelu(h1)
    h2 = lax.dot_general(h1, w2t, contract_rhs1,
                         preferred_element_type=jnp.float32) + b2    # h1 @ w2
    out = _layernorm_kernel(h2 + attn_out, g2, be2)

    # single lane-denser writeback slab: [ layer output (H) | attention probs (NH*S) ]
    out_ref[...] = jnp.concatenate([out, probs_all], axis=-1).astype(out_ref.dtype)


# --------------------------- parameter packing (call once) --------------------------
def pack_params(params):
    """Pack parameters into two slabs. Call ONCE outside the jitted layer."""
    wqkv = jnp.concatenate([params["wq"], params["wk"], params["wv"]], axis=1)  # (H,3H)
    w_packed = jnp.concatenate(
        [wqkv, params["wo"], params["w1"], params["w2"].T], axis=1)             # (H,384)

    def pad(v, width=INTER):
        return jnp.pad(v, ((0, 0), (0, width - v.shape[1])))

    bqkv = jnp.concatenate([params["bq"], params["bk"], params["bv"]], axis=1)  # (1,3H)
    vec_packed = jnp.concatenate(
        [pad(bqkv), params["b1"], pad(params["bo"]), pad(params["ln1_g"]),
         pad(params["ln1_b"]), pad(params["b2"]), pad(params["ln2_g"]),
         pad(params["ln2_b"])], axis=0)                                         # (8,128)
    return w_packed, vec_packed


# ------------------------------- wrapper -------------------------------------------
@jax.jit
def transformer_layer(x, attention_mask, w_packed, vec_packed):
    """x: [B, S, H] f32.  attention_mask: [B, 1, 1, S] additive mask (f32)."""
    B, S, H = x.shape
    x_flat = x.reshape(B * S, H)                     # glue reshape (free)
    mask2d = attention_mask.reshape(B, S)
    out_lanes = H + NUM_HEADS * S                    # 64

    out_slab = pl.pallas_call(
        layer_kernel,
        out_shape=jax.ShapeDtypeStruct((B * S, out_lanes), jnp.float32),
        grid_spec=pltpu.PrefetchScalarGridSpec(
            num_scalar_prefetch=0,
            grid=(1,),
            in_specs=[
                pl.BlockSpec((B * S, H), lambda i: (0, 0)),          # activations
                pl.BlockSpec((B, S), lambda i: (0, 0)),              # additive key mask
                pl.BlockSpec(w_packed.shape, lambda i: (0, 0)),      # packed weights
                pl.BlockSpec(vec_packed.shape, lambda i: (0, 0)),    # packed vectors
            ],
            out_specs=pl.BlockSpec((B * S, out_lanes), lambda i: (0, 0)),
        ),
        compiler_params=pltpu.CompilerParams(
            dimension_semantics=("arbitrary",)),
    )(x_flat, mask2d, w_packed, vec_packed)

    out = out_slab[:, :H].reshape(B, S, H)
    probs = out_slab[:, H:].reshape(B, S, NUM_HEADS, S).transpose(0, 2, 1, 3)
    return out, probs


# --------------------------- pure-JAX reference -------------------------------------
def _layernorm_ref(v, gamma, beta, eps=LN_EPS):
    u = jnp.mean(v, axis=-1, keepdims=True)
    s = jnp.mean((v - u) ** 2, axis=-1, keepdims=True)
    return gamma * ((v - u) / jnp.sqrt(s + eps)) + beta


def reference_layer(x, attention_mask, params):
    B, S, H = x.shape
    q = x @ params["wq"] + params["bq"]
    k = x @ params["wk"] + params["bk"]
    v = x @ params["wv"] + params["bv"]

    def split_heads(t):  # [B,S,H] -> [B,nh,S,hd]
        return t.reshape(B, S, NUM_HEADS, HEAD_DIM).transpose(0, 2, 1, 3)

    qh, kh, vh = split_heads(q), split_heads(k), split_heads(v)
    scores = jnp.einsum("bhqd,bhkd->bhqk", qh, kh) / math.sqrt(HEAD_DIM)
    scores = scores + attention_mask                       # [B,1,1,S] broadcast
    probs = jax.nn.softmax(scores, axis=-1)
    ctx = jnp.einsum("bhqk,bhkd->bhqd", probs, vh)
    ctx = ctx.transpose(0, 2, 1, 3).reshape(B, S, H)
    attn = ctx @ params["wo"] + params["bo"]
    attn_out = _layernorm_ref(attn + x, params["ln1_g"], params["ln1_b"])

    h1 = _gelu(attn_out @ params["w1"] + params["b1"])
    h2 = h1 @ params["w2"] + params["b2"]
    out = _layernorm_ref(h2 + attn_out, params["ln2_g"], params["ln2_b"])
    return out, probs


# ------------------------------------ main -------------------------------------------
if __name__ == "__main__":
    key = jax.random.PRNGKey(0)
    ks = jax.random.split(key, 16)

    def dense(kw, kb, din, dout):
        w = (jax.random.normal(kw, (din, dout), jnp.float32) * 0.02)
        b = (jax.random.normal(kb, (1, dout), jnp.float32) * 0.02)
        return w, b

    wq, bq = dense(ks[0], ks[1], HIDDEN, HIDDEN)
    wk, bk = dense(ks[2], ks[3], HIDDEN, HIDDEN)
    wv, bv = dense(ks[4], ks[5], HIDDEN, HIDDEN)
    wo, bo = dense(ks[6], ks[7], HIDDEN, HIDDEN)
    w1, b1 = dense(ks[8], ks[9], HIDDEN, INTER)
    w2, b2 = dense(ks[10], ks[11], INTER, HIDDEN)

    params = dict(
        wq=wq, bq=bq, wk=wk, bk=bk, wv=wv, bv=bv, wo=wo, bo=bo,
        ln1_g=jnp.ones((1, HIDDEN), jnp.float32), ln1_b=jnp.zeros((1, HIDDEN), jnp.float32),
        w1=w1, b1=b1, w2=w2, b2=b2,
        ln2_g=jnp.ones((1, HIDDEN), jnp.float32), ln2_b=jnp.zeros((1, HIDDEN), jnp.float32),
    )

    x = jax.random.normal(ks[12], (BATCH, SEQ, HIDDEN), jnp.float32)
    # BERT-style additive mask: 0 where attended, -10000 where masked.
    keep = jax.random.bernoulli(ks[13], 0.8, (BATCH, 1, 1, SEQ))
    attention_mask = jnp.where(keep, 0.0, -10000.0).astype(jnp.float32)
    # Guarantee at least the first position is attendable.
    attention_mask = attention_mask.at[:, :, :, 0].set(0.0)

    # Parameter packing happens once, outside the jitted per-call path.
    w_packed, vec_packed = pack_params(params)
    w_packed, vec_packed = jax.block_until_ready((w_packed, vec_packed))

    out, probs = transformer_layer(x, attention_mask, w_packed, vec_packed)
    jax.block_until_ready((out, probs))

    ref_out, ref_probs = reference_layer(x, attention_mask, params)
    np.testing.assert_allclose(np.asarray(out), np.asarray(ref_out), atol=1e-5, rtol=1e-5)
    np.testing.assert_allclose(np.asarray(probs), np.asarray(ref_probs), atol=1e-5, rtol=1e-5)

    print("KERNEL_OK")
</pallas_src>

<mosaic_0001>
module attributes {stable_mosaic.version = 11 : i64} {
  func.func @layer_kernel(%arg0: i32, %arg1: memref<16x32xf32, #tpu.memory_space<vmem>>, %arg2: memref<2x8xf32, #tpu.memory_space<vmem>>, %arg3: memref<32x384xf32, #tpu.memory_space<vmem>>, %arg4: memref<8x128xf32, #tpu.memory_space<vmem>>, %arg5: memref<16x64xf32, #tpu.memory_space<vmem>>) attributes {dimension_semantics = [#tpu.dimension_semantics<arbitrary>], iteration_bounds = array<i64: 1>, scalar_prefetch = 0 : i64, scratch_operands = 0 : i64, tpu.core_type = #tpu.core_type<tc>, window_params = [{pipeline_mode = #tpu.pipeline_mode<synchronous>, transform_indices = @transform_0, window_bounds = array<i64: 16, 32>}, {pipeline_mode = #tpu.pipeline_mode<synchronous>, transform_indices = @transform_1, window_bounds = array<i64: 2, 8>}, {pipeline_mode = #tpu.pipeline_mode<synchronous>, transform_indices = @transform_2, window_bounds = array<i64: 32, 384>}, {pipeline_mode = #tpu.pipeline_mode<synchronous>, transform_indices = @transform_3, window_bounds = array<i64: 8, 128>}, {pipeline_mode = #tpu.pipeline_mode<synchronous>, transform_indices = @transform_4, window_bounds = array<i64: 16, 64>}]} {
    %c0 = arith.constant 0 : index
    %c0_0 = arith.constant 0 : index
    %0 = vector.load %arg1[%c0, %c0_0] : memref<16x32xf32, #tpu.memory_space<vmem>>, vector<16x32xf32>
    %c0_1 = arith.constant 0 : index
    %c0_2 = arith.constant 0 : index
    %1 = vector.load %arg3[%c0_1, %c0_2] : memref<32x384xf32, #tpu.memory_space<vmem>>, vector<32x384xf32>
    %2 = vector.extract_strided_slice %1 {offsets = [0, 0], sizes = [32, 96], strides = [1, 1]} : vector<32x384xf32> to vector<32x96xf32>
    %3 = vector.extract_strided_slice %1 {offsets = [0, 96], sizes = [32, 32], strides = [1, 1]} : vector<32x384xf32> to vector<32x32xf32>
    %4 = vector.extract_strided_slice %1 {offsets = [0, 128], sizes = [32, 128], strides = [1, 1]} : vector<32x384xf32> to vector<32x128xf32>
    %5 = vector.extract_strided_slice %1 {offsets = [0, 256], sizes = [32, 128], strides = [1, 1]} : vector<32x384xf32> to vector<32x128xf32>
    %c0_3 = arith.constant 0 : index
    %c0_4 = arith.constant 0 : index
    %6 = vector.load %arg4[%c0_3, %c0_4] : memref<8x128xf32, #tpu.memory_space<vmem>>, vector<8x128xf32>
    %7 = vector.extract_strided_slice %6 {offsets = [0, 0], sizes = [1, 96], strides = [1, 1]} : vector<8x128xf32> to vector<1x96xf32>
    %8 = vector.extract_strided_slice %6 {offsets = [1, 0], sizes = [1, 128], strides = [1, 1]} : vector<8x128xf32> to vector<1x128xf32>
    %9 = vector.extract_strided_slice %6 {offsets = [2, 0], sizes = [1, 32], strides = [1, 1]} : vector<8x128xf32> to vector<1x32xf32>
    %10 = vector.extract_strided_slice %6 {offsets = [3, 0], sizes = [1, 32], strides = [1, 1]} : vector<8x128xf32> to vector<1x32xf32>
    %11 = vector.extract_strided_slice %6 {offsets = [4, 0], sizes = [1, 32], strides = [1, 1]} : vector<8x128xf32> to vector<1x32xf32>
    %12 = vector.extract_strided_slice %6 {offsets = [5, 0], sizes = [1, 32], strides = [1, 1]} : vector<8x128xf32> to vector<1x32xf32>
    %13 = vector.extract_strided_slice %6 {offsets = [6, 0], sizes = [1, 32], strides = [1, 1]} : vector<8x128xf32> to vector<1x32xf32>
    %14 = vector.extract_strided_slice %6 {offsets = [7, 0], sizes = [1, 32], strides = [1, 1]} : vector<8x128xf32> to vector<1x32xf32>
    %cst = arith.constant dense<0.000000e+00> : vector<16x96xf32>
    %15 = tpu.matmul %0, %2, %cst {dimension_numbers = #tpu.dot_dimension_numbers<[1], [0], [0], [1], [0, 0, 1, 1], [], []>} : vector<16x32xf32>, vector<32x96xf32>, vector<16x96xf32> -> vector<16x96xf32>
    %16 = vector.broadcast %7 : vector<1x96xf32> to vector<16x96xf32>
    %17 = arith.addf %15, %16 : vector<16x96xf32>
    %18 = vector.extract_strided_slice %17 {offsets = [0, 0], sizes = [8, 96], strides = [1, 1]} : vector<16x96xf32> to vector<8x96xf32>
    %c0_5 = arith.constant 0 : index
    %c0_6 = arith.constant 0 : index
    %19 = vector.load %arg2[%c0_5, %c0_6] : memref<2x8xf32, #tpu.memory_space<vmem>>, vector<1x8xf32>
    %20 = vector.shape_cast %19 : vector<1x8xf32> to vector<1x8xf32>
    %21 = vector.broadcast %20 : vector<1x8xf32> to vector<8x8xf32>
    %22 = vector.extract_strided_slice %18 {offsets = [0, 0], sizes = [8, 8], strides = [1, 1]} : vector<8x96xf32> to vector<8x8xf32>
    %23 = vector.extract_strided_slice %18 {offsets = [0, 32], sizes = [8, 8], strides = [1, 1]} : vector<8x96xf32> to vector<8x8xf32>
    %24 = vector.extract_strided_slice %18 {offsets = [0, 64], sizes = [8, 8], strides = [1, 1]} : vector<8x96xf32> to vector<8x8xf32>
    %cst_7 = arith.constant dense<0.000000e+00> : vector<8x8xf32>
    %25 = tpu.matmul %22, %23, %cst_7 {dimension_numbers = #tpu.dot_dimension_numbers<[1], [1], [0], [0], [0, 0, 1, 0], [], []>} : vector<8x8xf32>, vector<8x8xf32>, vector<8x8xf32> -> vector<8x8xf32>
    %cst_8 = arith.constant 0.353553385 : f32
    %26 = vector.broadcast %cst_8 : f32 to vector<8x8xf32>
    %27 = arith.mulf %25, %26 : vector<8x8xf32>
    %28 = arith.addf %27, %21 : vector<8x8xf32>
    %cst_9 = arith.constant dense<0xFF800000> : vector<8xf32>
    %29 = vector.multi_reduction <maximumf>, %28, %cst_9 [1] : vector<8x8xf32> to vector<8xf32>
    %30 = vector.shape_cast %29 : vector<8xf32> to vector<8x1xf32>
    %31 = vector.broadcast %30 : vector<8x1xf32> to vector<8x8xf32>
    %32 = arith.subf %28, %31 : vector<8x8xf32>
    %33 = math.exp %32 : vector<8x8xf32>
    %cst_10 = arith.constant dense<0.000000e+00> : vector<8xf32>
    %34 = vector.multi_reduction <add>, %33, %cst_10 [1] : vector<8x8xf32> to vector<8xf32>
    %35 = vector.shape_cast %34 : vector<8xf32> to vector<8x1xf32>
    %36 = tpu.reciprocal %35 : vector<8x1xf32> -> vector<8x1xf32>
    %37 = vector.broadcast %36 : vector<8x1xf32> to vector<8x8xf32>
    %38 = arith.mulf %33, %37 : vector<8x8xf32>
    %cst_11 = arith.constant dense<0.000000e+00> : vector<8x8xf32>
    %39 = tpu.matmul %38, %24, %cst_11 {dimension_numbers = #tpu.dot_dimension_numbers<[1], [0], [0], [1], [0, 0, 1, 1], [], []>} : vector<8x8xf32>, vector<8x8xf32>, vector<8x8xf32> -> vector<8x8xf32>
    %40 = vector.extract_strided_slice %18 {offsets = [0, 8], sizes = [8, 8], strides = [1, 1]} : vector<8x96xf32> to vector<8x8xf32>
    %41 = vector.extract_strided_slice %18 {offsets = [0, 40], sizes = [8, 8], strides = [1, 1]} : vector<8x96xf32> to vector<8x8xf32>
    %42 = vector.extract_strided_slice %18 {offsets = [0, 72], sizes = [8, 8], strides = [1, 1]} : vector<8x96xf32> to vector<8x8xf32>
    %cst_12 = arith.constant dense<0.000000e+00> : vector<8x8xf32>
    %43 = tpu.matmul %40, %41, %cst_12 {dimension_numbers = #tpu.dot_dimension_numbers<[1], [1], [0], [0], [0, 0, 1, 0], [], []>} : vector<8x8xf32>, vector<8x8xf32>, vector<8x8xf32> -> vector<8x8xf32>
    %cst_13 = arith.constant 0.353553385 : f32
    %44 = vector.broadcast %cst_13 : f32 to vector<8x8xf32>
    %45 = arith.mulf %43, %44 : vector<8x8xf32>
    %46 = arith.addf %45, %21 : vector<8x8xf32>
    %cst_14 = arith.constant dense<0xFF800000> : vector<8xf32>
    %47 = vector.multi_reduction <maximumf>, %46, %cst_14 [1] : vector<8x8xf32> to vector<8xf32>
    %48 = vector.shape_cast %47 : vector<8xf32> to vector<8x1xf32>
    %49 = vector.broadcast %48 : vector<8x1xf32> to vector<8x8xf32>
    %50 = arith.subf %46, %49 : vector<8x8xf32>
    %51 = math.exp %50 : vector<8x8xf32>
    %cst_15 = arith.constant dense<0.000000e+00> : vector<8xf32>
    %52 = vector.multi_reduction <add>, %51, %cst_15 [1] : vector<8x8xf32> to vector<8xf32>
    %53 = vector.shape_cast %52 : vector<8xf32> to vector<8x1xf32>
    %54 = tpu.reciprocal %53 : vector<8x1xf32> -> vector<8x1xf32>
    %55 = vector.broadcast %54 : vector<8x1xf32> to vector<8x8xf32>
    %56 = arith.mulf %51, %55 : vector<8x8xf32>
    %cst_16 = arith.constant dense<0.000000e+00> : vector<8x8xf32>
    %57 = tpu.matmul %56, %42, %cst_16 {dimension_numbers = #tpu.dot_dimension_numbers<[1], [0], [0], [1], [0, 0, 1, 1], [], []>} : vector<8x8xf32>, vector<8x8xf32>, vector<8x8xf32> -> vector<8x8xf32>
    %58 = vector.extract_strided_slice %18 {offsets = [0, 16], sizes = [8, 8], strides = [1, 1]} : vector<8x96xf32> to vector<8x8xf32>
    %59 = vector.extract_strided_slice %18 {offsets = [0, 48], sizes = [8, 8], strides = [1, 1]} : vector<8x96xf32> to vector<8x8xf32>
    %60 = vector.extract_strided_slice %18 {offsets = [0, 80], sizes = [8, 8], strides = [1, 1]} : vector<8x96xf32> to vector<8x8xf32>
    %cst_17 = arith.constant dense<0.000000e+00> : vector<8x8xf32>
    %61 = tpu.matmul %58, %59, %cst_17 {dimension_numbers = #tpu.dot_dimension_numbers<[1], [1], [0], [0], [0, 0, 1, 0], [], []>} : vector<8x8xf32>, vector<8x8xf32>, vector<8x8xf32> -> vector<8x8xf32>
    %cst_18 = arith.constant 0.353553385 : f32
    %62 = vector.broadcast %cst_18 : f32 to vector<8x8xf32>
    %63 = arith.mulf %61, %62 : vector<8x8xf32>
    %64 = arith.addf %63, %21 : vector<8x8xf32>
    %cst_19 = arith.constant dense<0xFF800000> : vector<8xf32>
    %65 = vector.multi_reduction <maximumf>, %64, %cst_19 [1] : vector<8x8xf32> to vector<8xf32>
    %66 = vector.shape_cast %65 : vector<8xf32> to vector<8x1xf32>
    %67 = vector.broadcast %66 : vector<8x1xf32> to vector<8x8xf32>
    %68 = arith.subf %64, %67 : vector<8x8xf32>
    %69 = math.exp %68 : vector<8x8xf32>
    %cst_20 = arith.constant dense<0.000000e+00> : vector<8xf32>
    %70 = vector.multi_reduction <add>, %69, %cst_20 [1] : vector<8x8xf32> to vector<8xf32>
    %71 = vector.shape_cast %70 : vector<8xf32> to vector<8x1xf32>
    %72 = tpu.reciprocal %71 : vector<8x1xf32> -> vector<8x1xf32>
    %73 = vector.broadcast %72 : vector<8x1xf32> to vector<8x8xf32>
    %74 = arith.mulf %69, %73 : vector<8x8xf32>
    %cst_21 = arith.constant dense<0.000000e+00> : vector<8x8xf32>
    %75 = tpu.matmul %74, %60, %cst_21 {dimension_numbers = #tpu.dot_dimension_numbers<[1], [0], [0], [1], [0, 0, 1, 1], [], []>} : vector<8x8xf32>, vector<8x8xf32>, vector<8x8xf32> -> vector<8x8xf32>
    %76 = vector.extract_strided_slice %18 {offsets = [0, 24], sizes = [8, 8], strides = [1, 1]} : vector<8x96xf32> to vector<8x8xf32>
    %77 = vector.extract_strided_slice %18 {offsets = [0, 56], sizes = [8, 8], strides = [1, 1]} : vector<8x96xf32> to vector<8x8xf32>
    %78 = vector.extract_strided_slice %18 {offsets = [0, 88], sizes = [8, 8], strides = [1, 1]} : vector<8x96xf32> to vector<8x8xf32>
    %cst_22 = arith.constant dense<0.000000e+00> : vector<8x8xf32>
    %79 = tpu.matmul %76, %77, %cst_22 {dimension_numbers = #tpu.dot_dimension_numbers<[1], [1], [0], [0], [0, 0, 1, 0], [], []>} : vector<8x8xf32>, vector<8x8xf32>, vector<8x8xf32> -> vector<8x8xf32>
    %cst_23 = arith.constant 0.353553385 : f32
    %80 = vector.broadcast %cst_23 : f32 to vector<8x8xf32>
    %81 = arith.mulf %79, %80 : vector<8x8xf32>
    %82 = arith.addf %81, %21 : vector<8x8xf32>
    %cst_24 = arith.constant dense<0xFF800000> : vector<8xf32>
    %83 = vector.multi_reduction <maximumf>, %82, %cst_24 [1] : vector<8x8xf32> to vector<8xf32>
    %84 = vector.shape_cast %83 : vector<8xf32> to vector<8x1xf32>
    %85 = vector.broadcast %84 : vector<8x1xf32> to vector<8x8xf32>
    %86 = arith.subf %82, %85 : vector<8x8xf32>
    %87 = math.exp %86 : vector<8x8xf32>
    %cst_25 = arith.constant dense<0.000000e+00> : vector<8xf32>
    %88 = vector.multi_reduction <add>, %87, %cst_25 [1] : vector<8x8xf32> to vector<8xf32>
    %89 = vector.shape_cast %88 : vector<8xf32> to vector<8x1xf32>
    %90 = tpu.reciprocal %89 : vector<8x1xf32> -> vector<8x1xf32>
    %91 = vector.broadcast %90 : vector<8x1xf32> to vector<8x8xf32>
    %92 = arith.mulf %87, %91 : vector<8x8xf32>
    %cst_26 = arith.constant dense<0.000000e+00> : vector<8x8xf32>
    %93 = tpu.matmul %92, %78, %cst_26 {dimension_numbers = #tpu.dot_dimension_numbers<[1], [0], [0], [1], [0, 0, 1, 1], [], []>} : vector<8x8xf32>, vector<8x8xf32>, vector<8x8xf32> -> vector<8x8xf32>
    %94 = tpu.concatenate %39, %57, %75, %93 in 1 : vector<8x8xf32>, vector<8x8xf32>, vector<8x8xf32>, vector<8x8xf32> -> vector<8x32xf32>
    %95 = tpu.concatenate %38, %56, %74, %92 in 1 : vector<8x8xf32>, vector<8x8xf32>, vector<8x8xf32>, vector<8x8xf32> -> vector<8x32xf32>
    %96 = vector.extract_strided_slice %17 {offsets = [8, 0], sizes = [8, 96], strides = [1, 1]} : vector<16x96xf32> to vector<8x96xf32>
    %c1 = arith.constant 1 : index
    %c0_27 = arith.constant 0 : index
    %97 = vector.load %arg2[%c1, %c0_27] : memref<2x8xf32, #tpu.memory_space<vmem>>, vector<1x8xf32>
    %98 = vector.shape_cast %97 : vector<1x8xf32> to vector<1x8xf32>
    %99 = vector.broadcast %98 : vector<1x8xf32> to vector<8x8xf32>
    %100 = vector.extract_strided_slice %96 {offsets = [0, 0], sizes = [8, 8], strides = [1, 1]} : vector<8x96xf32> to vector<8x8xf32>
    %101 = vector.extract_strided_slice %96 {offsets = [0, 32], sizes = [8, 8], strides = [1, 1]} : vector<8x96xf32> to vector<8x8xf32>
    %102 = vector.extract_strided_slice %96 {offsets = [0, 64], sizes = [8, 8], strides = [1, 1]} : vector<8x96xf32> to vector<8x8xf32>
    %cst_28 = arith.constant dense<0.000000e+00> : vector<8x8xf32>
    %103 = tpu.matmul %100, %101, %cst_28 {dimension_numbers = #tpu.dot_dimension_numbers<[1], [1], [0], [0], [0, 0, 1, 0], [], []>} : vector<8x8xf32>, vector<8x8xf32>, vector<8x8xf32> -> vector<8x8xf32>
    %cst_29 = arith.constant 0.353553385 : f32
    %104 = vector.broadcast %cst_29 : f32 to vector<8x8xf32>
    %105 = arith.mulf %103, %104 : vector<8x8xf32>
    %106 = arith.addf %105, %99 : vector<8x8xf32>
    %cst_30 = arith.constant dense<0xFF800000> : vector<8xf32>
    %107 = vector.multi_reduction <maximumf>, %106, %cst_30 [1] : vector<8x8xf32> to vector<8xf32>
    %108 = vector.shape_cast %107 : vector<8xf32> to vector<8x1xf32>
    %109 = vector.broadcast %108 : vector<8x1xf32> to vector<8x8xf32>
    %110 = arith.subf %106, %109 : vector<8x8xf32>
    %111 = math.exp %110 : vector<8x8xf32>
    %cst_31 = arith.constant dense<0.000000e+00> : vector<8xf32>
    %112 = vector.multi_reduction <add>, %111, %cst_31 [1] : vector<8x8xf32> to vector<8xf32>
    %113 = vector.shape_cast %112 : vector<8xf32> to vector<8x1xf32>
    %114 = tpu.reciprocal %113 : vector<8x1xf32> -> vector<8x1xf32>
    %115 = vector.broadcast %114 : vector<8x1xf32> to vector<8x8xf32>
    %116 = arith.mulf %111, %115 : vector<8x8xf32>
    %cst_32 = arith.constant dense<0.000000e+00> : vector<8x8xf32>
    %117 = tpu.matmul %116, %102, %cst_32 {dimension_numbers = #tpu.dot_dimension_numbers<[1], [0], [0], [1], [0, 0, 1, 1], [], []>} : vector<8x8xf32>, vector<8x8xf32>, vector<8x8xf32> -> vector<8x8xf32>
    %118 = vector.extract_strided_slice %96 {offsets = [0, 8], sizes = [8, 8], strides = [1, 1]} : vector<8x96xf32> to vector<8x8xf32>
    %119 = vector.extract_strided_slice %96 {offsets = [0, 40], sizes = [8, 8], strides = [1, 1]} : vector<8x96xf32> to vector<8x8xf32>
    %120 = vector.extract_strided_slice %96 {offsets = [0, 72], sizes = [8, 8], strides = [1, 1]} : vector<8x96xf32> to vector<8x8xf32>
    %cst_33 = arith.constant dense<0.000000e+00> : vector<8x8xf32>
    %121 = tpu.matmul %118, %119, %cst_33 {dimension_numbers = #tpu.dot_dimension_numbers<[1], [1], [0], [0], [0, 0, 1, 0], [], []>} : vector<8x8xf32>, vector<8x8xf32>, vector<8x8xf32> -> vector<8x8xf32>
    %cst_34 = arith.constant 0.353553385 : f32
    %122 = vector.broadcast %cst_34 : f32 to vector<8x8xf32>
    %123 = arith.mulf %121, %122 : vector<8x8xf32>
    %124 = arith.addf %123, %99 : vector<8x8xf32>
    %cst_35 = arith.constant dense<0xFF800000> : vector<8xf32>
    %125 = vector.multi_reduction <maximumf>, %124, %cst_35 [1] : vector<8x8xf32> to vector<8xf32>
    %126 = vector.shape_cast %125 : vector<8xf32> to vector<8x1xf32>
    %127 = vector.broadcast %126 : vector<8x1xf32> to vector<8x8xf32>
    %128 = arith.subf %124, %127 : vector<8x8xf32>
    %129 = math.exp %128 : vector<8x8xf32>
    %cst_36 = arith.constant dense<0.000000e+00> : vector<8xf32>
    %130 = vector.multi_reduction <add>, %129, %cst_36 [1] : vector<8x8xf32> to vector<8xf32>
    %131 = vector.shape_cast %130 : vector<8xf32> to vector<8x1xf32>
    %132 = tpu.reciprocal %131 : vector<8x1xf32> -> vector<8x1xf32>
    %133 = vector.broadcast %132 : vector<8x1xf32> to vector<8x8xf32>
    %134 = arith.mulf %129, %133 : vector<8x8xf32>
    %cst_37 = arith.constant dense<0.000000e+00> : vector<8x8xf32>
    %135 = tpu.matmul %134, %120, %cst_37 {dimension_numbers = #tpu.dot_dimension_numbers<[1], [0], [0], [1], [0, 0, 1, 1], [], []>} : vector<8x8xf32>, vector<8x8xf32>, vector<8x8xf32> -> vector<8x8xf32>
    %136 = vector.extract_strided_slice %96 {offsets = [0, 16], sizes = [8, 8], strides = [1, 1]} : vector<8x96xf32> to vector<8x8xf32>
    %137 = vector.extract_strided_slice %96 {offsets = [0, 48], sizes = [8, 8], strides = [1, 1]} : vector<8x96xf32> to vector<8x8xf32>
    %138 = vector.extract_strided_slice %96 {offsets = [0, 80], sizes = [8, 8], strides = [1, 1]} : vector<8x96xf32> to vector<8x8xf32>
    %cst_38 = arith.constant dense<0.000000e+00> : vector<8x8xf32>
    %139 = tpu.matmul %136, %137, %cst_38 {dimension_numbers = #tpu.dot_dimension_numbers<[1], [1], [0], [0], [0, 0, 1, 0], [], []>} : vector<8x8xf32>, vector<8x8xf32>, vector<8x8xf32> -> vector<8x8xf32>
    %cst_39 = arith.constant 0.353553385 : f32
    %140 = vector.broadcast %cst_39 : f32 to vector<8x8xf32>
    %141 = arith.mulf %139, %140 : vector<8x8xf32>
    %142 = arith.addf %141, %99 : vector<8x8xf32>
    %cst_40 = arith.constant dense<0xFF800000> : vector<8xf32>
    %143 = vector.multi_reduction <maximumf>, %142, %cst_40 [1] : vector<8x8xf32> to vector<8xf32>
    %144 = vector.shape_cast %143 : vector<8xf32> to vector<8x1xf32>
    %145 = vector.broadcast %144 : vector<8x1xf32> to vector<8x8xf32>
    %146 = arith.subf %142, %145 : vector<8x8xf32>
    %147 = math.exp %146 : vector<8x8xf32>
    %cst_41 = arith.constant dense<0.000000e+00> : vector<8xf32>
    %148 = vector.multi_reduction <add>, %147, %cst_41 [1] : vector<8x8xf32> to vector<8xf32>
    %149 = vector.shape_cast %148 : vector<8xf32> to vector<8x1xf32>
    %150 = tpu.reciprocal %149 : vector<8x1xf32> -> vector<8x1xf32>
    %151 = vector.broadcast %150 : vector<8x1xf32> to vector<8x8xf32>
    %152 = arith.mulf %147, %151 : vector<8x8xf32>
    %cst_42 = arith.constant dense<0.000000e+00> : vector<8x8xf32>
    %153 = tpu.matmul %152, %138, %cst_42 {dimension_numbers = #tpu.dot_dimension_numbers<[1], [0], [0], [1], [0, 0, 1, 1], [], []>} : vector<8x8xf32>, vector<8x8xf32>, vector<8x8xf32> -> vector<8x8xf32>
    %154 = vector.extract_strided_slice %96 {offsets = [0, 24], sizes = [8, 8], strides = [1, 1]} : vector<8x96xf32> to vector<8x8xf32>
    %155 = vector.extract_strided_slice %96 {offsets = [0, 56], sizes = [8, 8], strides = [1, 1]} : vector<8x96xf32> to vector<8x8xf32>
    %156 = vector.extract_strided_slice %96 {offsets = [0, 88], sizes = [8, 8], strides = [1, 1]} : vector<8x96xf32> to vector<8x8xf32>
    %cst_43 = arith.constant dense<0.000000e+00> : vector<8x8xf32>
    %157 = tpu.matmul %154, %155, %cst_43 {dimension_numbers = #tpu.dot_dimension_numbers<[1], [1], [0], [0], [0, 0, 1, 0], [], []>} : vector<8x8xf32>, vector<8x8xf32>, vector<8x8xf32> -> vector<8x8xf32>
    %cst_44 = arith.constant 0.353553385 : f32
    %158 = vector.broadcast %cst_44 : f32 to vector<8x8xf32>
    %159 = arith.mulf %157, %158 : vector<8x8xf32>
    %160 = arith.addf %159, %99 : vector<8x8xf32>
    %cst_45 = arith.constant dense<0xFF800000> : vector<8xf32>
    %161 = vector.multi_reduction <maximumf>, %160, %cst_45 [1] : vector<8x8xf32> to vector<8xf32>
    %162 = vector.shape_cast %161 : vector<8xf32> to vector<8x1xf32>
    %163 = vector.broadcast %162 : vector<8x1xf32> to vector<8x8xf32>
    %164 = arith.subf %160, %163 : vector<8x8xf32>
    %165 = math.exp %164 : vector<8x8xf32>
    %cst_46 = arith.constant dense<0.000000e+00> : vector<8xf32>
    %166 = vector.multi_reduction <add>, %165, %cst_46 [1] : vector<8x8xf32> to vector<8xf32>
    %167 = vector.shape_cast %166 : vector<8xf32> to vector<8x1xf32>
    %168 = tpu.reciprocal %167 : vector<8x1xf32> -> vector<8x1xf32>
    %169 = vector.broadcast %168 : vector<8x1xf32> to vector<8x8xf32>
    %170 = arith.mulf %165, %169 : vector<8x8xf32>
    %cst_47 = arith.constant dense<0.000000e+00> : vector<8x8xf32>
    %171 = tpu.matmul %170, %156, %cst_47 {dimension_numbers = #tpu.dot_dimension_numbers<[1], [0], [0], [1], [0, 0, 1, 1], [], []>} : vector<8x8xf32>, vector<8x8xf32>, vector<8x8xf32> -> vector<8x8xf32>
    %172 = tpu.concatenate %117, %135, %153, %171 in 1 : vector<8x8xf32>, vector<8x8xf32>, vector<8x8xf32>, vector<8x8xf32> -> vector<8x32xf32>
    %173 = tpu.concatenate %116, %134, %152, %170 in 1 : vector<8x8xf32>, vector<8x8xf32>, vector<8x8xf32>, vector<8x8xf32> -> vector<8x32xf32>
    %174 = tpu.concatenate %94, %172 in 0 : vector<8x32xf32>, vector<8x32xf32> -> vector<16x32xf32>
    %175 = tpu.concatenate %95, %173 in 0 : vector<8x32xf32>, vector<8x32xf32> -> vector<16x32xf32>
    %cst_48 = arith.constant dense<0.000000e+00> : vector<16x32xf32>
    %176 = tpu.matmul %174, %3, %cst_48 {dimension_numbers = #tpu.dot_dimension_numbers<[1], [0], [0], [1], [0, 0, 1, 1], [], []>} : vector<16x32xf32>, vector<32x32xf32>, vector<16x32xf32> -> vector<16x32xf32>
    %177 = vector.broadcast %9 : vector<1x32xf32> to vector<16x32xf32>
    %178 = arith.addf %176, %177 : vector<16x32xf32>
    %179 = arith.addf %178, %0 : vector<16x32xf32>
    %cst_49 = arith.constant dense<0.000000e+00> : vector<16xf32>
    %180 = vector.multi_reduction <add>, %179, %cst_49 [1] : vector<16x32xf32> to vector<16xf32>
    %181 = vector.shape_cast %180 : vector<16xf32> to vector<16x1xf32>
    %cst_50 = arith.constant 3.200000e+01 : f32
    %182 = vector.broadcast %cst_50 : f32 to vector<16x1xf32>
    %183 = arith.divf %181, %182 : vector<16x1xf32>
    %184 = vector.broadcast %183 : vector<16x1xf32> to vector<16x32xf32>
    %185 = arith.subf %179, %184 : vector<16x32xf32>
    %186 = arith.mulf %185, %185 : vector<16x32xf32>
    %cst_51 = arith.constant dense<0.000000e+00> : vector<16xf32>
    %187 = vector.multi_reduction <add>, %186, %cst_51 [1] : vector<16x32xf32> to vector<16xf32>
    %188 = vector.shape_cast %187 : vector<16xf32> to vector<16x1xf32>
    %cst_52 = arith.constant 3.200000e+01 : f32
    %189 = vector.broadcast %cst_52 : f32 to vector<16x1xf32>
    %190 = arith.divf %188, %189 : vector<16x1xf32>
    %191 = vector.broadcast %183 : vector<16x1xf32> to vector<16x32xf32>
    %192 = arith.subf %179, %191 : vector<16x32xf32>
    %cst_53 = arith.constant 9.99999996E-13 : f32
    %193 = vector.broadcast %cst_53 : f32 to vector<16x1xf32>
    %194 = arith.addf %190, %193 : vector<16x1xf32>
    %195 = math.rsqrt %194 : vector<16x1xf32>
    %196 = vector.broadcast %195 : vector<16x1xf32> to vector<16x32xf32>
    %197 = arith.mulf %192, %196 : vector<16x32xf32>
    %198 = vector.broadcast %10 : vector<1x32xf32> to vector<16x32xf32>
    %199 = arith.mulf %198, %197 : vector<16x32xf32>
    %200 = vector.broadcast %11 : vector<1x32xf32> to vector<16x32xf32>
    %201 = arith.addf %199, %200 : vector<16x32xf32>
    %cst_54 = arith.constant dense<0.000000e+00> : vector<16x128xf32>
    %202 = tpu.matmul %201, %4, %cst_54 {dimension_numbers = #tpu.dot_dimension_numbers<[1], [0], [0], [1], [0, 0, 1, 1], [], []>} : vector<16x32xf32>, vector<32x128xf32>, vector<16x128xf32> -> vector<16x128xf32>
    %203 = vector.broadcast %8 : vector<1x128xf32> to vector<16x128xf32>
    %204 = arith.addf %202, %203 : vector<16x128xf32>
    %cst_55 = arith.constant 5.000000e-01 : f32
    %205 = vector.broadcast %cst_55 : f32 to vector<16x128xf32>
    %206 = arith.mulf %204, %205 : vector<16x128xf32>
    %cst_56 = arith.constant 1.41421354 : f32
    %207 = vector.broadcast %cst_56 : f32 to vector<16x128xf32>
    %208 = arith.divf %204, %207 : vector<16x128xf32>
    %209 = math.erf %208 : vector<16x128xf32>
    %cst_57 = arith.constant 1.000000e+00 : f32
    %210 = vector.broadcast %cst_57 : f32 to vector<16x128xf32>
    %211 = arith.addf %210, %209 : vector<16x128xf32>
    %212 = arith.mulf %206, %211 : vector<16x128xf32>
    %cst_58 = arith.constant dense<0.000000e+00> : vector<16x32xf32>
    %213 = tpu.matmul %212, %5, %cst_58 {dimension_numbers = #tpu.dot_dimension_numbers<[1], [1], [0], [0], [0, 0, 1, 0], [], []>} : vector<16x128xf32>, vector<32x128xf32>, vector<16x32xf32> -> vector<16x32xf32>
    %214 = vector.broadcast %12 : vector<1x32xf32> to vector<16x32xf32>
    %215 = arith.addf %213, %214 : vector<16x32xf32>
    %216 = arith.addf %215, %201 : vector<16x32xf32>
    %cst_59 = arith.constant dense<0.000000e+00> : vector<16xf32>
    %217 = vector.multi_reduction <add>, %216, %cst_59 [1] : vector<16x32xf32> to vector<16xf32>
    %218 = vector.shape_cast %217 : vector<16xf32> to vector<16x1xf32>
    %cst_60 = arith.constant 3.200000e+01 : f32
    %219 = vector.broadcast %cst_60 : f32 to vector<16x1xf32>
    %220 = arith.divf %218, %219 : vector<16x1xf32>
    %221 = vector.broadcast %220 : vector<16x1xf32> to vector<16x32xf32>
    %222 = arith.subf %216, %221 : vector<16x32xf32>
    %223 = arith.mulf %222, %222 : vector<16x32xf32>
    %cst_61 = arith.constant dense<0.000000e+00> : vector<16xf32>
    %224 = vector.multi_reduction <add>, %223, %cst_61 [1] : vector<16x32xf32> to vector<16xf32>
    %225 = vector.shape_cast %224 : vector<16xf32> to vector<16x1xf32>
    %cst_62 = arith.constant 3.200000e+01 : f32
    %226 = vector.broadcast %cst_62 : f32 to vector<16x1xf32>
    %227 = arith.divf %225, %226 : vector<16x1xf32>
    %228 = vector.broadcast %220 : vector<16x1xf32> to vector<16x32xf32>
    %229 = arith.subf %216, %228 : vector<16x32xf32>
    %cst_63 = arith.constant 9.99999996E-13 : f32
    %230 = vector.broadcast %cst_63 : f32 to vector<16x1xf32>
    %231 = arith.addf %227, %230 : vector<16x1xf32>
    %232 = math.rsqrt %231 : vector<16x1xf32>
    %233 = vector.broadcast %232 : vector<16x1xf32> to vector<16x32xf32>
    %234 = arith.mulf %229, %233 : vector<16x32xf32>
    %235 = vector.broadcast %13 : vector<1x32xf32> to vector<16x32xf32>
    %236 = arith.mulf %235, %234 : vector<16x32xf32>
    %237 = vector.broadcast %14 : vector<1x32xf32> to vector<16x32xf32>
    %238 = arith.addf %236, %237 : vector<16x32xf32>
    %239 = tpu.concatenate %238, %175 in 1 : vector<16x32xf32>, vector<16x32xf32> -> vector<16x64xf32>
    %c0_64 = arith.constant 0 : index
    %c0_65 = arith.constant 0 : index
    %240 = vector.load %arg5[%c0_64, %c0_65] : memref<16x64xf32, #tpu.memory_space<vmem>>, vector<16x64xf32>
    tpu.vector_store %arg5[%c0_64, %c0_65], %239 {strides = array<i32>} : memref<16x64xf32, #tpu.memory_space<vmem>>, vector<16x64xf32>,
    return
  }
  func.func @transform_0(%arg0: i32) -> (i32, i32) {
    %c0_i32 = arith.constant 0 : i32
    %c0_i32_0 = arith.constant 0 : i32
    %c0_i32_1 = arith.constant 0 : i32
    return %c0_i32, %c0_i32_0 : i32, i32
  }
  func.func @transform_1(%arg0: i32) -> (i32, i32) {
    %c0_i32 = arith.constant 0 : i32
    %c0_i32_0 = arith.constant 0 : i32
    %c0_i32_1 = arith.constant 0 : i32
    return %c0_i32, %c0_i32_0 : i32, i32
  }
  func.func @transform_2(%arg0: i32) -> (i32, i32) {
    %c0_i32 = arith.constant 0 : i32
    %c0_i32_0 = arith.constant 0 : i32
    %c0_i32_1 = arith.constant 0 : i32
    return %c0_i32, %c0_i32_0 : i32, i32
  }
  func.func @transform_3(%arg0: i32) -> (i32, i32) {
    %c0_i32 = arith.constant 0 : i32
    %c0_i32_0 = arith.constant 0 : i32
    %c0_i32_1 = arith.constant 0 : i32
    return %c0_i32, %c0_i32_0 : i32, i32
  }
  func.func @transform_4(%arg0: i32) -> (i32, i32) {
    %c0_i32 = arith.constant 0 : i32
    %c0_i32_0 = arith.constant 0 : i32
    %c0_i32_1 = arith.constant 0 : i32
    return %c0_i32, %c0_i32_0 : i32, i32
  }
}

</mosaic_0001>

<bundles_post_ra>
// kernel: transformer_layer.1
= control target key start
LH: loop header
LB: loop body
LE: loop exit
PB: predicated region body
PF: predicated region fallthrough
CT: control target
= control target key end

     0   :  { %9 = vsyncpa [#allocation3], 0  ;;  %s1672_s0 = inlined_call_operand.hbm [shape: f32[16,32], index: 0, kind: input, shape index: {}]   ;;  %s1673_s1 = inlined_call_operand.vmem [shape: f32[2,8], index: 1, kind: input, shape index: {}]   ;;  %s1674_s2 = inlined_call_operand.hbm [shape: f32[32,384], index: 2, kind: input, shape index: {}]   ;;  %s1675_s3 = inlined_call_operand.hbm [shape: f32[8,128], index: 3, kind: input, shape index: {}]   ;;  %s1676_s4 = inlined_call_operand.vmem [shape: f32[16,64], index: 4, kind: output, shape index: {}]  }
   0x1   :  { %10 = vsyncpa [#allocation5], 0  ;;  %s30_s17 = sshll.u32 %s1674_s2, 4  ;;  %s1323_s18 = smov [#allocation4]   ;;  %s31_s17 = int_to_ptr.hbm [resolvable:$true] %s30_s17 }
   0x2   :  { %s32_s19 = sshll.u32 %s1323_s18, 4  ;;  %s15_s22 = sshll.u32 %s1672_s0, 4  ;;  %s33_s19 = int_to_ptr.vmem [resolvable:$true] %s32_s19  ;;  %s16_s22 = int_to_ptr.hbm [resolvable:$true] %s15_s22 }
   0x3   :  { %s1324_s23 = smov 384   ;;  %s1325_s24 = smov 24  }
   0x4   :  { %38 = dma.hbm_to_vmem [thread:$0]  %s31_s17, 1536, %s33_s19, [#allocation5], %s1324_s23, %s1324_s23, %s1325_s24  }
   0x5   :  { %s1326_s25 = smov [#allocation2]   ;;  %s1327_s27 = smov 128  }
   0x6   :  { %s17_s26 = sshll.u32 %s1326_s25, 4  ;;  %s1328_s28 = smov 8   ;;  %s18_s26 = int_to_ptr.vmem [resolvable:$true] %s17_s26 }
   0x7   :  { %23 = dma.hbm_to_vmem [thread:$0]  %s16_s22, 256, %s18_s26, [#allocation3], %s1327_s27, %s1327_s27, %s1328_s28  }
   0x8   :  { %s44_s30 = sshll.u32 %s1675_s3, 4  ;;  %s1329_s5 = smov [#allocation6]   ;;  %s45_s30 = int_to_ptr.hbm [resolvable:$true] %s44_s30 }
   0x9   :  { %s46_s6 = sshll.u32 %s1329_s5, 4  ;;  %s47_s6 = int_to_ptr.vmem [resolvable:$true] %s46_s6 }
   0xa   :  { %49 = dma.hbm_to_vmem [thread:$0]  %s45_s30, 128, %s47_s6, [#allocation5]  }
   0xb   :  { %1319 = dma.done.wait [#allocation3], 256  }
   0xc   :  { %1320 = vsyncadd [#allocation3], 4294967040 }
   0xd   :  { %1321 = dma.done.wait [#allocation5], 1664  }
   0xe   :  { %1322 = vsyncadd [#allocation5], 4294965632  ;;  %v1381_v0 = vld [vmem:[#allocation4 + $0x48] sm:$0xff]  ;;  %v1383_v1 = vld [vmem:[#allocation4 + $0x30] sm:$0xff]  ;;  %vm78_vm0 = vcmask 261120   ;;  %s1330_s0 = smov 120  }
   0xf   :  { %97 = vmatpush.msra.mxu0 %v1381_v0  ;;  %v1186_v2 = vpack.i.bf16 %v1383_v1, %v1381_v0  ;;  %v1388_v3 = vld [vmem:[#allocation4 + $0x18] sm:$0xff]  ;;  %v1390_v4 = vld [vmem:[#allocation4] sm:$0xff]  ;;  %v1396_v6 = vld [vmem:[#allocation2] sm:$0xff]  ;;  %s1331_s3 = smov 96   ;;  %s1332_s7 = smov 64   ;;  %vm113_vm1 = vcmask 64512  }
  0x10   :  { %v1191_v5 = vpack.i.bf16 %v1390_v4, %v1388_v3  ;;  %v1401_v7 = vld [vmem:[#allocation6] sm:$0xff]  ;;  %s1333_s8 = smov 80   ;;  %s1334_s9 = smov 112   ;;  %v1425_v15 = vld [vmem:[%s1673_s1] ss:$0 sm:$0xff]  ;;  %v1442_v43 = vld [vmem:[#allocation2 + $0x8] sm:$0xff] }
  0x11   :  { %98 = vmatpush.msra.mxu0 %v1383_v1  ;;  %v77_v8 = vperm.slane %v1401_v7, 0  ;;  %s1335_s12 = smov 88   ;;  %s1336_s13 = smov 48  }
  0x12   :  { %s1337_s14 = smov 72   ;;  %s1338_s15 = smov 56  }
  0x13   :  { %99 = vmatpush.msra.mxu0 %v1388_v3  ;;  %s1339_s16 = smov 104   ;;  %s1341_s19 = smov 32  }
  0x14   :  { %s1342_s20 = smov 16  }
  0x15   :  { %100 = vmatpush.msra.mxu0 %v1390_v4 }
  0x16   :  { %1132 = vmatmul.msk.f32.vlgmr.msra.gmra.mxu0 %vm78_vm0, %v1396_v6 }
  0x1e   :  { %1133 = vmatmul.msk.f32.gmra.mxu0 %vm78_vm0, %v1442_v43 }
  0x93   :  { %v102_v9 = vpop.f32.mrf.mxu0 }
  0x94   :  { %v1406_v10 = vadd.f32 %v102_v9, %v77_v8 }
  0x96   :  { %190 = vrot.lane.b32.xlu2 %v1406_v10, %s1330_s0  ;;  %111 = vrot.lane.b32.xlu0 %v1406_v10, %s1331_s3 }
  0x9b   :  { %v105_v52 = vpop.f32.mrf.mxu0 }
  0x9c   :  { %v1454_v53 = vadd.f32 %v105_v52, %v77_v8 }
  0x9e   :  { %164 = vrot.lane.b32.xlu2 %v1406_v10, %s1332_s7 }
  0xa6   :  { %272 = vrot.lane.b32.xlu2 %v1406_v10, %s1333_s8 }
  0xae   :  { %270 = vrot.lane.b32.xlu2 %v1406_v10, %s1334_s9 }
  0xf0   :  { %v191_v11 = vpop.permute.xlu2 %190 }
  0xf8   :  { %v165_v12 = vpop.permute.xlu2 %164 }
 0x100   :  { %v273_v14 = vpop.permute.xlu2 %272 }
 0x108   :  { %v112_v13 = vpop.permute.xlu0 %111  ;;  %v271_v38 = vpop.permute.xlu2 %270 }
 0x109   :  { %1134 = vmatpush.xpose.msk.msra.mxu1 %vm113_vm1, %v112_v13 }
 0x10c   :  { %1135 = vmatmul.msk.f32.vlgmr.msra.gmra.mxu1 %vm113_vm1, %v1406_v10 }
 0x10d   :  { %185 = vmatpush.msrb.mxu1 %v165_v12 }
 0x10f   :  { %1140 = vmatpush.xpose.msk.msra.mxu1 %vm113_vm1, %v273_v14 }
 0x189   :  { %v135_v16 = vpop.f32.mrf.mxu1 }
 0x18a   :  { %v138_v17 = vmul.f32 0.35355338, %v135_v16 }
 0x18c   :  { %v139_v18 = vadd.f32 %v1425_v15, %v138_v17 }
 0x18e   :  { %v140_v19 = vsel %vm113_vm1, %v139_v18, -inf }
 0x18f   :  { %141 = vmax.xlane.f32.xlu0 %v140_v19 }
 0x202   :  { %v142_v20 = vpop.xlane.xlu0 %141 }
 0x203   :  { %v143_v21 = vsub.f32 %v139_v18, %v142_v20 }
 0x205   :  { %v144_v22 = vmul.f32 1.442695, %v143_v21 }
 0x207   :  { %1198 = vpow2.f32 %v144_v22 }
 0x20d   :  { %v1199_v23 = vpop.eup %1198 }
 0x20e   :  { %v146_v24 = vsel %vm113_vm1, %v1199_v23, 0.0 }
 0x20f   :  { %147 = vadd.xlane.f32.xlu1 %v146_v24 }
 0x228   :  { %192 = vrot.lane.b32.xlu1 %v1406_v10, %s1335_s12 }
 0x282   :  { %v148_v25 = vpop.xlane.xlu1 %147 }
 0x283   :  { %1200 = vrcp.f32 %v148_v25  ;;  %v160_v29 = vand.u32 2147483648, %v148_v25  ;;  %v158_v31 = vand.u32 2147483647, %v148_v25  ;;  %vm154_vm3 = vweird.f32 %v148_v25 }
 0x285   :  { %v161_v33 = vor.u32 1.1754944e-38, %v160_v29  ;;  %vm159_vm5 = vcmp.eq.f32.partialorder %v158_v31, 8.507059e+37 }
 0x289   :  { %v1201_v26 = vpop.eup %1200 }
 0x28a   :  { %v150_v27 = vmul.f32 %v1201_v26, %v148_v25  ;;  %vm155_vm2 = vweird.f32 %v1201_v26 }
 0x28b   :  { %vm156_vm4 = vmor %vm154_vm3, %vm155_vm2 }
 0x28c   :  { %v151_v28 = vsub.f32 1.0, %v150_v27 }
 0x28e   :  { %v152_v30 = vmul.f32 %v1201_v26, %v151_v28 }
 0x290   :  { %v153_v32 = vadd.f32 %v1201_v26, %v152_v30 }
 0x292   :  { %v157_v34 = vsel %vm156_vm4, %v1201_v26, %v153_v32 }
 0x293   :  { %v162_v35 = vsel %vm159_vm5, %v161_v33, %v157_v34 }
 0x294   :  { %v1432_v36 = vmul.f32 %v1199_v23, %v162_v35 }
 0x296   :  { %1136 = vmatmul.msk.f32.vlgmr.msrb.gmra.mxu1 %vm113_vm1, %v1432_v36 }
 0x29a   :  { %v193_v37 = vpop.permute.xlu1 %192 }
 0x29b   :  { %1137 = vmatpush.xpose.msk.msra.mxu3 %vm113_vm1, %v193_v37 }
 0x29e   :  { %1138 = vmatmul.msk.f32.vlgmr.msra.gmra.mxu3 %vm113_vm1, %v191_v11  ;;  %1141 = vmatmul.msk.f32.vlgmr.msra.gmra.mxu1 %vm113_vm1, %v271_v38 }
 0x313   :  { %v1439_v39 = vpop.f32.mrf.mxu1 }
 0x31b   :  { %v295_v40 = vpop.f32.mrf.mxu1 }
 0x31c   :  { %v298_v41 = vmul.f32 0.35355338, %v295_v40 }
 0x31e   :  { %v299_v42 = vadd.f32 %v1425_v15, %v298_v41 }
 0x320   :  { %v300_v44 = vsel %vm113_vm1, %v299_v42, -inf }
 0x321   :  { %301 = vmax.xlane.f32.xlu1 %v300_v44  ;;  %v215_v45 = vpop.f32.mrf.mxu3 }
 0x322   :  { %v218_v46 = vmul.f32 0.35355338, %v215_v45 }
 0x324   :  { %v219_v47 = vadd.f32 %v1425_v15, %v218_v46 }
 0x326   :  { %v220_v48 = vsel %vm113_vm1, %v219_v47, -inf }
 0x327   :  { %221 = vmax.xlane.f32.xlu2 %v220_v48 }
 0x33a   :  { %324 = vrot.lane.b32.xlu1 %v1406_v10, %s1336_s13 }
 0x33f   :  { %352 = vrot.lane.b32.xlu2 %v1406_v10, %s1337_s14 }
 0x342   :  { %540 = vrot.lane.b32.xlu1 %v1454_v53, %s1330_s0 }
 0x347   :  { %542 = vrot.lane.b32.xlu2 %v1454_v53, %s1335_s12 }
 0x34a   :  { %620 = vrot.lane.b32.xlu1 %v1454_v53, %s1334_s9 }
 0x34f   :  { %702 = vrot.lane.b32.xlu2 %v1454_v53, %s1337_s14 }
 0x394   :  { %v302_v54 = vpop.xlane.xlu1 %301 }
 0x395   :  { %v303_v58 = vsub.f32 %v299_v42, %v302_v54 }
 0x397   :  { %v304_v59 = vmul.f32 1.442695, %v303_v58 }
 0x39a   :  { %v222_v49 = vpop.xlane.xlu2 %221 }
 0x39b   :  { %v223_v50 = vsub.f32 %v219_v47, %v222_v49 }
 0x39d   :  { %v224_v51 = vmul.f32 1.442695, %v223_v50  ;;  %v1197_v50 = vld [vmem:[%s1673_s1 + $0x1] ss:$0 sm:$0xff]  ;;  %s1340_s1 = smov 40  }
 0x39f   :  { %1202 = vpow2.f32 %v224_v51 }
 0x3a0   :  { %1204 = vpow2.f32 %v304_v59 }
 0x3a2   :  { %v353_v11 = vpop.permute.xlu2 %352 }
 0x3a5   :  { %v1203_v55 = vpop.eup %1202 }
 0x3a6   :  { %v226_v56 = vsel %vm113_vm1, %v1203_v55, 0.0  ;;  %v1205_v60 = vpop.eup %1204 }
 0x3a7   :  { %227 = vadd.xlane.f32.xlu0 %v226_v56  ;;  %v306_v61 = vsel %vm113_vm1, %v1205_v60, 0.0 }
 0x3aa   :  { %v543_v21 = vpop.permute.xlu2 %542 }
 0x3ac   :  { %v325_v57 = vpop.permute.xlu1 %324 }
 0x3ad   :  { %345 = vmatpush.msrb.mxu3 %v325_v57 }
 0x3b2   :  { %v703_v24 = vpop.permute.xlu2 %702 }
 0x3b4   :  { %v541_v26 = vpop.permute.xlu1 %540 }
 0x3bb   :  { %244 = vrot.lane.b32.xlu0 %v1406_v10, %s1338_s15 }
 0x3bc   :  { %v621_v44 = vpop.permute.xlu1 %620 }
 0x3c3   :  { %350 = vrot.lane.b32.xlu0 %v1406_v10, %s1339_s16 }
 0x3cb   :  { %462 = vrot.lane.b32.xlu0 %v1454_v53, %s1331_s3 }
 0x3d3   :  { %622 = vrot.lane.b32.xlu0 %v1454_v53, %s1333_s8 }
 0x3fd   :  { %307 = vadd.xlane.f32.xlu0 %v306_v61 }
 0x411   :  { %700 = vrot.lane.b32.xlu0 %v1454_v53, %s1339_s16 }
 0x41a   :  { %v228_v62 = vpop.xlane.xlu0 %227 }
 0x41b   :  { %1206 = vrcp.f32 %v228_v62  ;;  %v240_v12 = vand.u32 2147483648, %v228_v62  ;;  %v238_v14 = vand.u32 2147483647, %v228_v62  ;;  %vm234_vm7 = vweird.f32 %v228_v62 }
 0x41d   :  { %v241_v17 = vor.u32 1.1754944e-38, %v240_v12  ;;  %vm239_vm9 = vcmp.eq.f32.partialorder %v238_v14, 8.507059e+37 }
 0x421   :  { %v1207_v63 = vpop.eup %1206 }
 0x422   :  { %v230_v8 = vmul.f32 %v1207_v63, %v228_v62  ;;  %vm235_vm6 = vweird.f32 %v1207_v63 }
 0x423   :  { %vm236_vm8 = vmor %vm234_vm7, %vm235_vm6 }
 0x424   :  { %v231_v9 = vsub.f32 1.0, %v230_v8 }
 0x426   :  { %v232_v13 = vmul.f32 %v1207_v63, %v231_v9 }
 0x428   :  { %v233_v16 = vadd.f32 %v1207_v63, %v232_v13 }
 0x42a   :  { %v237_v18 = vsel %vm236_vm8, %v1207_v63, %v233_v16 }
 0x42b   :  { %v242_v19 = vsel %vm239_vm9, %v241_v17, %v237_v18 }
 0x42c   :  { %v1473_v20 = vmul.f32 %v1203_v55, %v242_v19 }
 0x42d   :  { %v245_v22 = vpop.permute.xlu0 %244 }
 0x42e   :  { %265 = vmatpush.msra.mxu2 %v245_v22 }
 0x42f   :  { %1139 = vmatmul.msk.f32.vlgmr.msra.gmra.mxu2 %vm113_vm1, %v1473_v20 }
 0x430   :  { %1143 = vmatpush.xpose.msk.msrb.mxu2 %vm113_vm1, %v353_v11 }
 0x434   :  { %1149 = vmatpush.xpose.msk.msra.mxu2 %vm113_vm1, %v543_v21 }
 0x435   :  { %v351_v23 = vpop.permute.xlu0 %350 }
 0x437   :  { %1144 = vmatmul.msk.f32.vlgmr.msrb.gmra.mxu2 %vm113_vm1, %v351_v23 }
 0x438   :  { %1155 = vmatpush.xpose.msk.msrb.mxu2 %vm113_vm1, %v703_v24 }
 0x43d   :  { %v463_v25 = vpop.permute.xlu0 %462 }
 0x43e   :  { %1146 = vmatpush.xpose.msk.msra.mxu3 %vm113_vm1, %v463_v25 }
 0x43f   :  { %1150 = vmatmul.msk.f32.vlgmr.msra.gmra.mxu2 %vm113_vm1, %v541_v26 }
 0x445   :  { %v623_v27 = vpop.permute.xlu0 %622 }
 0x470   :  { %v308_v28 = vpop.xlane.xlu0 %307 }
 0x471   :  { %1208 = vrcp.f32 %v308_v28  ;;  %v320_v32 = vand.u32 2147483648, %v308_v28  ;;  %v318_v34 = vand.u32 2147483647, %v308_v28  ;;  %vm314_vm11 = vweird.f32 %v308_v28 }
 0x473   :  { %v321_v37 = vor.u32 1.1754944e-38, %v320_v32  ;;  %vm319_vm13 = vcmp.eq.f32.partialorder %v318_v34, 8.507059e+37 }
 0x477   :  { %v1209_v29 = vpop.eup %1208 }
 0x478   :  { %v310_v30 = vmul.f32 %v1209_v29, %v308_v28  ;;  %vm315_vm10 = vweird.f32 %v1209_v29 }
 0x479   :  { %vm316_vm12 = vmor %vm314_vm11, %vm315_vm10 }
 0x47a   :  { %v311_v31 = vsub.f32 1.0, %v310_v30 }
 0x47c   :  { %v312_v33 = vmul.f32 %v1209_v29, %v311_v31 }
 0x47e   :  { %v313_v35 = vadd.f32 %v1209_v29, %v312_v33 }
 0x480   :  { %v317_v38 = vsel %vm316_vm12, %v1209_v29, %v313_v35 }
 0x481   :  { %v322_v40 = vsel %vm319_vm13, %v321_v37, %v317_v38 }
 0x482   :  { %v1483_v41 = vmul.f32 %v1205_v60, %v322_v40 }
 0x483   :  { %v701_v42 = vpop.permute.xlu0 %700 }
 0x484   :  { %1142 = vmatmul.msk.f32.vlgmr.msrb.gmra.mxu3 %vm113_vm1, %v1483_v41  ;;  %1156 = vmatmul.msk.f32.vlgmr.msrb.gmra.mxu2 %vm113_vm1, %v701_v42 }
 0x485   :  { %1152 = vmatpush.xpose.msk.msrb.mxu3 %vm113_vm1, %v623_v27 }
 0x48c   :  { %1147 = vmatmul.msk.f32.vlgmr.msra.gmra.mxu3 %vm113_vm1, %v1454_v53 }
 0x494   :  { %1153 = vmatmul.msk.f32.vlgmr.msrb.gmra.mxu3 %vm113_vm1, %v621_v44 }
 0x4b2   :  { %v1492_v45 = vpop.f32.mrf.mxu2 }
 0x4ba   :  { %v375_v46 = vpop.f32.mrf.mxu2 }
 0x4bb   :  { %v378_v47 = vmul.f32 0.35355338, %v375_v46 }
 0x4bd   :  { %v379_v48 = vadd.f32 %v1425_v15, %v378_v47 }
 0x4bf   :  { %v380_v49 = vsel %vm113_vm1, %v379_v48, -inf }
 0x4c0   :  { %381 = vmax.xlane.f32.xlu2 %v380_v49 }
 0x4c2   :  { %v565_v51 = vpop.f32.mrf.mxu2 }
 0x4c3   :  { %v568_v52 = vmul.f32 0.35355338, %v565_v51 }
 0x4c5   :  { %v569_v54 = vadd.f32 %v1197_v50, %v568_v52 }
 0x4c7   :  { %v570_v55 = vsel %vm113_vm1, %v569_v54, -inf }
 0x4c8   :  { %571 = vmax.xlane.f32.xlu0 %v570_v55 }
 0x507   :  { %v1500_v56 = vpop.f32.mrf.mxu3  ;;  %v725_v59 = vpop.f32.mrf.mxu2 }
 0x508   :  { %v728_v15 = vmul.f32 0.35355338, %v725_v59 }
 0x50a   :  { %v729_v8 = vadd.f32 %v1197_v50, %v728_v15 }
 0x50c   :  { %v730_v11 = vsel %vm113_vm1, %v729_v8, -inf }
 0x50f   :  { %v485_v57 = vpop.f32.mrf.mxu3 }
 0x510   :  { %v488_v58 = vmul.f32 0.35355338, %v485_v57 }
 0x512   :  { %v489_v60 = vadd.f32 %v1197_v50, %v488_v58 }
 0x514   :  { %v490_v61 = vsel %vm113_vm1, %v489_v60, -inf }
 0x515   :  { %491 = vmax.xlane.f32.xlu1 %v490_v61 }
 0x517   :  { %v645_v62 = vpop.f32.mrf.mxu3 }
 0x518   :  { %v648_v63 = vmul.f32 0.35355338, %v645_v62 }
 0x51a   :  { %v649_v9 = vadd.f32 %v1197_v50, %v648_v63 }
 0x51c   :  { %v650_v12 = vsel %vm113_vm1, %v649_v9, -inf }
 0x51d   :  { %731 = vmax.xlane.f32.xlu1 %v730_v11  ;;  %651 = vmax.xlane.f32.xlu2 %v650_v12 }
 0x533   :  { %v382_v13 = vpop.xlane.xlu2 %381 }
 0x534   :  { %v383_v14 = vsub.f32 %v379_v48, %v382_v13 }
 0x536   :  { %v384_v16 = vmul.f32 1.442695, %v383_v14 }
 0x538   :  { %1210 = vpow2.f32 %v384_v16 }
 0x53b   :  { %v572_v17 = vpop.xlane.xlu0 %571 }
 0x53c   :  { %v573_v18 = vsub.f32 %v569_v54, %v572_v17 }
 0x53e   :  { %v1211_v19 = vpop.eup %1210  ;;  %v574_v21 = vmul.f32 1.442695, %v573_v18 }
 0x53f   :  { %v386_v22 = vsel %vm113_vm1, %v1211_v19, 0.0 }
 0x540   :  { %1212 = vpow2.f32 %v574_v21  ;;  %387 = vadd.xlane.f32.xlu0 %v386_v22 }
 0x546   :  { %v1506_v23 = vpop.eup %1212 }
 0x547   :  { %v576_v24 = vsel %vm113_vm1, %v1506_v23, 0.0 }
 0x548   :  { %577 = vadd.xlane.f32.xlu1 %v576_v24 }
 0x554   :  { %514 = vrot.lane.b32.xlu0 %v1454_v53, %s1332_s7 }
 0x561   :  { %404 = vrot.lane.b32.xlu1 %v1406_v10, %s1340_s1 }
 0x569   :  { %754 = vrot.lane.b32.xlu1 %v1454_v53, %s1340_s1 }
 0x571   :  { %1192 = vrot.lane.b32.xlu1 %v1191_v5, %s1341_s19 }
 0x588   :  { %v492_v25 = vpop.xlane.xlu1 %491 }
 0x589   :  { %v493_v32 = vsub.f32 %v489_v60, %v492_v25 }
 0x58b   :  { %v494_v33 = vmul.f32 1.442695, %v493_v32 }
 0x590   :  { %v652_v26 = vpop.xlane.xlu2 %651  ;;  %v732_v27 = vpop.xlane.xlu1 %731 }
 0x591   :  { %v653_v28 = vsub.f32 %v649_v9, %v652_v26  ;;  %v733_v29 = vsub.f32 %v729_v8, %v732_v27  ;;  %v1343_v26 = vmov 32.0  }
 0x593   :  { %v654_v30 = vmul.f32 1.442695, %v653_v28  ;;  %v734_v31 = vmul.f32 1.442695, %v733_v29 }
 0x595   :  { %1214 = vpow2.f32 %v654_v30 }
 0x596   :  { %1216 = vpow2.f32 %v734_v31 }
 0x597   :  { %1218 = vpow2.f32 %v494_v33 }
 0x59b   :  { %v1518_v10 = vpop.eup %1214 }
 0x59c   :  { %v1520_v34 = vpop.eup %1216  ;;  %v656_v3 = vsel %vm113_vm1, %v1518_v10, 0.0 }
 0x59d   :  { %657 = vadd.xlane.f32.xlu0 %v656_v3  ;;  %v736_v4 = vsel %vm113_vm1, %v1520_v34, 0.0  ;;  %v1526_v5 = vpop.eup %1218 }
 0x59e   :  { %737 = vadd.xlane.f32.xlu2 %v736_v4  ;;  %v496_v35 = vsel %vm113_vm1, %v1526_v5, 0.0 }
 0x5a6   :  { %497 = vadd.xlane.f32.xlu2 %v496_v35 }
 0x5b1   :  { %674 = vrot.lane.b32.xlu0 %v1454_v53, %s1336_s13 }
 0x5b3   :  { %v388_v37 = vpop.xlane.xlu0 %387 }
 0x5b4   :  { %1220 = vrcp.f32 %v388_v37  ;;  %v400_v48 = vand.u32 2147483648, %v388_v37  ;;  %vm394_vm15 = vweird.f32 %v388_v37  ;;  %v398_v49 = vand.u32 2147483647, %v388_v37 }
 0x5b6   :  { %v401_v51 = vor.u32 1.1754944e-38, %v400_v48  ;;  %vm399_vm3 = vcmp.eq.f32.partialorder %v398_v49, 8.507059e+37 }
 0x5b9   :  { %431 = vrot.lane.b32.xlu0 %v1492_v45, %s1328_s28 }
 0x5ba   :  { %v1221_v38 = vpop.eup %1220 }
 0x5bb   :  { %v390_v40 = vmul.f32 %v1221_v38, %v388_v37  ;;  %vm395_vm14 = vweird.f32 %v1221_v38  ;;  %v578_v45 = vpop.xlane.xlu1 %577 }
 0x5bc   :  { %vm396_vm2 = vmor %vm394_vm15, %vm395_vm14  ;;  %1222 = vrcp.f32 %v578_v45  ;;  %v590_v60 = vand.u32 2147483648, %v578_v45  ;;  %vm584_vm5 = vweird.f32 %v578_v45  ;;  %v588_v15 = vand.u32 2147483647, %v578_v45 }
 0x5bd   :  { %v391_v42 = vsub.f32 1.0, %v390_v40 }
 0x5be   :  { %594 = vrot.lane.b32.xlu2 %v1454_v53, %s1338_s15  ;;  %v591_v11 = vor.u32 1.1754944e-38, %v590_v60  ;;  %vm589_vm7 = vcmp.eq.f32.partialorder %v588_v15, 8.507059e+37 }
 0x5bf   :  { %v392_v44 = vmul.f32 %v1221_v38, %v391_v42 }
 0x5c1   :  { %v393_v47 = vadd.f32 %v1221_v38, %v392_v44 }
 0x5c2   :  { %v1223_v1 = vpop.eup %1222 }
 0x5c3   :  { %v397_v50 = vsel %vm396_vm2, %v1221_v38, %v393_v47  ;;  %vm585_vm4 = vweird.f32 %v1223_v1 }
 0x5c4   :  { %v402_v53 = vsel %vm399_vm3, %v401_v51, %v397_v50  ;;  %vm586_vm6 = vmor %vm584_vm5, %vm585_vm4 }
 0x5c5   :  { %v1542_v0 = vmul.f32 %v1211_v19, %v402_v53 }
 0x5c6   :  { %1187 = vrot.lane.b32.xlu2 %v1186_v2, %s1341_s19  ;;  %v515_v46 = vpop.permute.xlu0 %514  ;;  %v580_v2 = vmul.f32 %v1223_v1, %v578_v45 }
 0x5c7   :  { %535 = vmatpush.msrb.mxu0 %v515_v46 }
 0x5c8   :  { %v581_v54 = vsub.f32 1.0, %v580_v2 }
 0x5ca   :  { %v582_v58 = vmul.f32 %v1223_v1, %v581_v54 }
 0x5ce   :  { %435 = vrot.lane.b32.xlu2 %v1500_v56, %s1342_s20  ;;  %v583_v56 = vadd.f32 %v1223_v1, %v582_v58 }
 0x5d0   :  { %v587_v8 = vsel %vm586_vm6, %v1223_v1, %v583_v56  ;;  %vm443_vm6 = vcmask 130048  }
 0x5d1   :  { %v592_v14 = vsel %vm589_vm7, %v591_v11, %v587_v8  ;;  %vm445_vm7 = vcmask 195584  }
 0x5d2   :  { %v1554_v25 = vmul.f32 %v1506_v23, %v592_v14 }
 0x5d3   :  { %v405_v52 = vpop.permute.xlu1 %404 }
 0x5d4   :  { %425 = vmatpush.msrb.mxu1 %v405_v52 }
 0x5d5   :  { %1145 = vmatmul.msk.f32.vlgmr.msrb.gmra.mxu1 %vm113_vm1, %v1542_v0 }
 0x5db   :  { %v755_v27 = vpop.permute.xlu1 %754 }
 0x5e3   :  { %v1193_v1 = vpop.permute.xlu1 %1192 }
 0x5e4   :  { %v1195_v2 = vunpack.i.h.bf16 %v1193_v1  ;;  %v1194_v54 = vunpack.i.l.bf16 %v1193_v1 }
 0x610   :  { %v1546_v55 = vpop.xlane.xlu0 %657 }
 0x611   :  { %v738_v57 = vpop.xlane.xlu2 %737  ;;  %v670_v46 = vand.u32 2147483648, %v1546_v55  ;;  %vm664_vm3 = vweird.f32 %v1546_v55  ;;  %v668_v45 = vand.u32 2147483647, %v1546_v55 }
 0x612   :  { %1224 = vrcp.f32 %v738_v57  ;;  %v748_v18 = vand.u32 2147483647, %v738_v57  ;;  %v750_v19 = vand.u32 2147483648, %v738_v57  ;;  %vm744_vm9 = vweird.f32 %v738_v57 }
 0x613   :  { %1226 = vrcp.f32 %v1546_v55  ;;  %v671_v51 = vor.u32 1.1754944e-38, %v670_v46  ;;  %vm669_vm5 = vcmp.eq.f32.partialorder %v668_v45, 8.507059e+37  ;;  %v68_v46 = vld [vmem:[#allocation4 + $0x20] sm:$0xff] }
 0x614   :  { %vm749_vm11 = vcmp.eq.f32.partialorder %v748_v18, 8.507059e+37  ;;  %v751_v31 = vor.u32 1.1754944e-38, %v750_v19 }
 0x618   :  { %v1225_v59 = vpop.eup %1224 }
 0x619   :  { %v740_v61 = vmul.f32 %v1225_v59, %v738_v57  ;;  %v498_v62 = vpop.xlane.xlu2 %497  ;;  %v1549_v63 = vpop.eup %1226  ;;  %vm745_vm8 = vweird.f32 %v1225_v59 }
 0x61a   :  { %1228 = vrcp.f32 %v498_v62  ;;  %v660_v12 = vmul.f32 %v1549_v63, %v1546_v55  ;;  %vm1556_vm10 = vmor %vm744_vm9, %vm745_vm8  ;;  %v510_v32 = vand.u32 2147483648, %v498_v62  ;;  %v508_v3 = vand.u32 2147483647, %v498_v62 }
 0x61b   :  { %v741_v9 = vsub.f32 1.0, %v740_v61  ;;  %vm504_vm13 = vweird.f32 %v498_v62  ;;  %vm665_vm14 = vweird.f32 %v1549_v63  ;;  %1230 = vrcp.f32 %v1343_v26 }
 0x61c   :  { %v661_v21 = vsub.f32 1.0, %v660_v12  ;;  %v511_v37 = vor.u32 1.1754944e-38, %v510_v32  ;;  %vm509_vm2 = vcmp.eq.f32.partialorder %v508_v3, 8.507059e+37  ;;  %vm666_vm4 = vmor %vm664_vm3, %vm665_vm14 }
 0x61d   :  { %v742_v13 = vmul.f32 %v1225_v59, %v741_v9 }
 0x61e   :  { %v662_v23 = vmul.f32 %v1549_v63, %v661_v21 }
 0x61f   :  { %v743_v16 = vadd.f32 %v1225_v59, %v742_v13 }
 0x620   :  { %v1229_v17 = vpop.eup %1228  ;;  %v663_v38 = vadd.f32 %v1549_v63, %v662_v23 }
 0x621   :  { %v500_v22 = vmul.f32 %v1229_v17, %v498_v62  ;;  %v595_v24 = vpop.permute.xlu2 %594  ;;  %v747_v28 = vsel %vm1556_vm10, %v1225_v59, %v743_v16  ;;  %vm505_vm12 = vweird.f32 %v1229_v17 }
 0x622   :  { %615 = vmatpush.msra.mxu1 %v595_v24  ;;  %v752_v4 = vsel %vm749_vm11, %v751_v31, %v747_v28  ;;  %vm506_vm15 = vmor %vm504_vm13, %vm505_vm12 }
 0x623   :  { %v501_v29 = vsub.f32 1.0, %v500_v22  ;;  %1151 = vmatmul.msk.f32.vlgmr.msra.gmra.mxu1 %vm113_vm1, %v1554_v25  ;;  %v675_v30 = vpop.permute.xlu0 %674  ;;  %v1568_v42 = vmul.f32 %v1520_v34, %v752_v4  ;;  %v667_v34 = vsel %vm666_vm4, %v1549_v63, %v663_v38 }
 0x624   :  { %775 = vmatpush.msrb.mxu1 %v755_v27  ;;  %695 = vmatpush.msra.mxu0 %v675_v30  ;;  %v672_v53 = vsel %vm669_vm5, %v671_v51, %v667_v34  ;;  %v1231_v27 = vpop.eup %1230 }
 0x625   :  { %v502_v33 = vmul.f32 %v1229_v17, %v501_v29  ;;  %v1584_v52 = vmul.f32 %v1518_v10, %v672_v53  ;;  %v862_v28 = vmul.f32 32.0, %v1231_v27  ;;  %vm866_vm8 = vweird.f32 %v1231_v27 }
 0x627   :  { %v503_v35 = vadd.f32 %v1229_v17, %v502_v33  ;;  %v863_v29 = vsub.f32 1.0, %v862_v28 }
 0x629   :  { %v1188_v40 = vpop.permute.xlu2 %1187  ;;  %v507_v44 = vsel %vm506_vm15, %v1229_v17, %v503_v35  ;;  %v864_v30 = vmul.f32 %v1231_v27, %v863_v29  ;;  %v75_v29 = vld [vmem:[#allocation4 + $0x58] sm:$0xff] }
 0x62a   :  { %v1190_v47 = vunpack.i.h.bf16 %v1188_v40  ;;  %v1189_v48 = vunpack.i.l.bf16 %v1188_v40  ;;  %v512_v49 = vsel %vm509_vm2, %v511_v37, %v507_v44  ;;  %v74_v40 = vld [vmem:[#allocation4 + $0x50] sm:$0xff]  ;;  %v71_v44 = vld [vmem:[#allocation4 + $0x38] sm:$0xff]  ;;  %1050 = vmatpush.xpose.msra.mxu2 %v75_v29 }
 0x62b   :  { %1157 = vmatmul.msk.f32.vlgmr.msrb.gmra.mxu1 %vm113_vm1, %v1568_v42  ;;  %v1576_v50 = vmul.f32 %v1526_v5, %v512_v49  ;;  %v432_v56 = vpop.permute.xlu0 %431  ;;  %v865_v31 = vadd.f32 %v1231_v27, %v864_v30 }
 0x62c   :  { %842 = vmatpush.msra.mxu3 %v1189_v48  ;;  %v442_v60 = vsel %vm113_vm1, %v1439_v39, %v432_v56  ;;  %v807_v39 = vperm.slane %v1401_v7, 2 }
 0x62d   :  { %1148 = vmatmul.msk.f32.vlgmr.msrb.gmra.mxu0 %vm113_vm1, %v1576_v50 }
 0x62e   :  { %843 = vmatpush.msra.mxu3 %v1190_v47  ;;  %931 = vmatpush.msrb.mxu0 %v74_v40  ;;  %v65_v47 = vld [vmem:[#allocation4 + $0x8] sm:$0xff]  ;;  %v66_v40 = vld [vmem:[#allocation4 + $0x10] sm:$0xff] }
 0x630   :  { %844 = vmatpush.msra.mxu3 %v1194_v54  ;;  %932 = vmatpush.msrb.mxu0 %v71_v44 }
 0x631   :  { %v436_v59 = vpop.permute.xlu2 %435 }
 0x632   :  { %845 = vmatpush.msra.mxu3 %v1195_v2  ;;  %v444_v15 = vsel %vm443_vm6, %v442_v60, %v436_v59  ;;  %933 = vmatpush.msrb.mxu0 %v68_v46 }
 0x634   :  { %934 = vmatpush.msrb.mxu0 %v65_v47 }
 0x635   :  { %1154 = vmatmul.msk.f32.vlgmr.msra.gmra.mxu0 %vm113_vm1, %v1584_v52 }
 0x652   :  { %v427_v5 = vpop.f32.mrf.mxu1 }
 0x653   :  { %439 = vrot.lane.b32.xlu0 %v427_v5, %s1325_s24 }
 0x6a0   :  { %v617_v55 = vpop.f32.mrf.mxu1 }
 0x6a1   :  { %781 = vrot.lane.b32.xlu1 %v617_v55, %s1328_s28  ;;  %v909_v55 = vperm.slane %v1401_v7, 4 }
 0x6a8   :  { %v777_v57 = vpop.f32.mrf.mxu1 }
 0x6a9   :  { %789 = vrot.lane.b32.xlu0 %v777_v57, %s1325_s24 }
 0x6aa   :  { %v537_v58 = vpop.f32.mrf.mxu0 }
 0x6b2   :  { %v697_v10 = vpop.f32.mrf.mxu0 }
 0x6b3   :  { %785 = vrot.lane.b32.xlu2 %v697_v10, %s1342_s20 }
 0x6c5   :  { %v440_v61 = vpop.permute.xlu0 %439 }
 0x6c6   :  { %v446_v62 = vsel %vm445_vm7, %v444_v15, %v440_v61 }
 0x6c7   :  { %1158 = vmatmul.msk.f32.vlgmr.msra.gmra.mxu3 %vm78_vm0, %v446_v62 }
 0x70d   :  { %v786_v9 = vpop.permute.xlu2 %785 }
 0x713   :  { %v782_v63 = vpop.permute.xlu1 %781 }
 0x714   :  { %v792_v8 = vsel %vm113_vm1, %v537_v58, %v782_v63 }
 0x715   :  { %v793_v12 = vsel %vm443_vm6, %v792_v8, %v786_v9 }
 0x71b   :  { %v790_v11 = vpop.permute.xlu0 %789 }
 0x71c   :  { %v794_v13 = vsel %vm445_vm7, %v793_v12, %v790_v11 }
 0x71d   :  { %1159 = vmatmul.msk.f32.gmra.mxu3 %vm78_vm0, %v794_v13  ;;  %v1344_v13 = vmov 1.4142135  }
 0x74a   :  { %v847_v14 = vpop.f32.mrf.mxu3 }
 0x74b   :  { %v848_v16 = vadd.f32 %v847_v14, %v807_v39 }
 0x74d   :  { %v853_v17 = vadd.f32 %v848_v16, %v1396_v6  ;;  %v1608_v6 = vsel %vm866_vm8, %v1231_v27, %v865_v31 }
 0x74f   :  { %v855_v18 = vsel %vm78_vm0, %v853_v17, 0.0 }
 0x750   :  { %856 = vadd.xlane.f32.xlu1 %v855_v18 }
 0x7a0   :  { %v850_v19 = vpop.f32.mrf.mxu3 }
 0x7a1   :  { %v851_v21 = vadd.f32 %v850_v19, %v807_v39  ;;  %v912_v19 = vperm.slane %v1401_v7, 1 }
 0x7a3   :  { %v854_v22 = vadd.f32 %v851_v21, %v1442_v43 }
 0x7a5   :  { %v858_v24 = vsel %vm78_vm0, %v854_v22, 0.0 }
 0x7a6   :  { %859 = vadd.xlane.f32.xlu2 %v858_v24 }
 0x7be   :  { %450 = vrot.lane.b32.xlu2 %v1483_v41, %s1342_s20 }
 0x7c3   :  { %v857_v32 = vpop.xlane.xlu1 %856 }
 0x7c4   :  { %v868_v23 = vmul.f32 %v1608_v6, %v857_v32 }
 0x7c6   :  { %v870_v43 = vsub.f32 %v853_v17, %v868_v23 }
 0x7c8   :  { %v872_v33 = vmul.f32 %v870_v43, %v870_v43 }
 0x7ca   :  { %v874_v3 = vsel %vm78_vm0, %v872_v33, 0.0 }
 0x7cb   :  { %875 = vadd.xlane.f32.xlu0 %v874_v3 }
 0x7df   :  { %453 = vrot.lane.b32.xlu0 %v1542_v0, %s1325_s24 }
 0x819   :  { %v860_v4 = vpop.xlane.xlu2 %859 }
 0x81a   :  { %v869_v35 = vmul.f32 %v1608_v6, %v860_v4 }
 0x81c   :  { %v871_v37 = vsub.f32 %v854_v22, %v869_v35 }
 0x81e   :  { %v873_v38 = vmul.f32 %v871_v37, %v871_v37 }
 0x820   :  { %v877_v41 = vsel %vm78_vm0, %v873_v38, 0.0 }
 0x821   :  { %878 = vadd.xlane.f32.xlu1 %v877_v41 }
 0x83a   :  { %447 = vrot.lane.b32.xlu1 %v1473_v20, %s1328_s28  ;;  %v906_v20 = vperm.slane %v1401_v7, 3  ;;  %v69_v7 = vld [vmem:[#allocation4 + $0x28] sm:$0xff] }
 0x83e   :  { %v876_v0 = vpop.xlane.xlu0 %875 }
 0x83f   :  { %v880_v48 = vmul.f32 %v876_v0, %v1608_v6 }
 0x841   :  { %v882_v49 = vadd.f32 1e-12, %v880_v48 }
 0x842   :  { %798 = vrot.lane.b32.xlu1 %v1584_v52, %s1342_s20 }
 0x843   :  { %1232 = vrsqrt.f32 %v882_v49  ;;  %vm890_vm10 = vweird.f32 %v882_v49 }
 0x849   :  { %v1233_v45 = vpop.eup %1232 }
 0x84a   :  { %v885_v34 = vmul.f32 %v1233_v45, %v882_v49  ;;  %vm891_vm9 = vweird.f32 %v1233_v45 }
 0x84b   :  { %vm892_vm11 = vmor %vm890_vm10, %vm891_vm9 }
 0x84c   :  { %v886_v51 = vmul.f32 %v1233_v45, %v885_v34 }
 0x84e   :  { %v887_v53 = vmul.f32 0.5, %v886_v51 }
 0x850   :  { %v888_v5 = vsub.f32 1.5, %v887_v53 }
 0x852   :  { %v889_v1 = vmul.f32 %v1233_v45, %v888_v5 }
 0x854   :  { %v893_v2 = vsel %vm892_vm11, %v1233_v45, %v889_v1 }
 0x855   :  { %v904_v54 = vmul.f32 %v893_v2, %v870_v43  ;;  %v72_v43 = vld [vmem:[#allocation4 + $0x40] sm:$0xff] }
 0x856   :  { %1051 = vmatpush.xpose.msra.mxu2 %v72_v43 }
 0x857   :  { %v907_v57 = vmul.f32 %v906_v20, %v904_v54 }
 0x859   :  { %v1623_v58 = vadd.f32 %v909_v55, %v907_v57 }
 0x85a   :  { %1052 = vmatpush.xpose.msra.mxu2 %v69_v7 }
 0x85b   :  { %1160 = vmatmul.msk.f32.vlgmr.msrb.gmra.mxu0 %vm78_vm0, %v1623_v58 }
 0x85e   :  { %1053 = vmatpush.xpose.msra.mxu2 %v66_v40 }
 0x894   :  { %v879_v52 = vpop.xlane.xlu1 %878 }
 0x895   :  { %v881_v10 = vmul.f32 %v879_v52, %v1608_v6 }
 0x897   :  { %v883_v56 = vadd.f32 1e-12, %v881_v10 }
 0x899   :  { %1234 = vrsqrt.f32 %v883_v56  ;;  %vm900_vm13 = vweird.f32 %v883_v56 }
 0x89a   :  { %1236 = vrcp.f32 %v1344_v13 }
 0x89f   :  { %v1235_v59 = vpop.eup %1234 }
 0x8a0   :  { %v895_v60 = vmul.f32 %v1235_v59, %v883_v56  ;;  %vm901_vm12 = vweird.f32 %v1235_v59  ;;  %v1237_v39 = vpop.eup %1236 }
 0x8a1   :  { %vm902_vm14 = vmor %vm900_vm13, %vm901_vm12  ;;  %v945_v14 = vmul.f32 1.4142135, %v1237_v39  ;;  %vm949_vm15 = vweird.f32 %v1237_v39 }
 0x8a2   :  { %v896_v15 = vmul.f32 %v1235_v59, %v895_v60 }
 0x8a3   :  { %v946_v16 = vsub.f32 1.0, %v945_v14 }
 0x8a4   :  { %v897_v61 = vmul.f32 0.5, %v896_v15 }
 0x8a5   :  { %v947_v17 = vmul.f32 %v1237_v39, %v946_v16 }
 0x8a6   :  { %v898_v62 = vsub.f32 1.5, %v897_v61 }
 0x8a7   :  { %v948_v18 = vadd.f32 %v1237_v39, %v947_v17 }
 0x8a8   :  { %v899_v63 = vmul.f32 %v1235_v59, %v898_v62 }
 0x8a9   :  { %v950_v22 = vsel %vm949_vm15, %v1237_v39, %v948_v18 }
 0x8aa   :  { %v903_v8 = vsel %vm902_vm14, %v1235_v59, %v899_v63 }
 0x8ab   :  { %v905_v9 = vmul.f32 %v903_v8, %v871_v37 }
 0x8ad   :  { %v908_v11 = vmul.f32 %v906_v20, %v905_v9 }
 0x8af   :  { %v1628_v12 = vadd.f32 %v909_v55, %v908_v11 }
 0x8b1   :  { %1161 = vmatmul.msk.f32.gmra.mxu0 %vm78_vm0, %v1628_v12 }
 0x8d8   :  { %v936_v21 = vpop.f32.mrf.mxu0 }
 0x8d9   :  { %v937_v24 = vadd.f32 %v936_v21, %v912_v19 }
 0x8db   :  { %v951_v26 = vmul.f32 %v950_v22, %v937_v24  ;;  %v942_v15 = vmul.f32 0.5, %v937_v24 }
 0x8dd   :  { %v953_v27 = vmul.f32 %v951_v26, %v951_v26 }
 0x8df   :  { %v954_v28 = vmin.f32 %v953_v27, 16.0 }
 0x8e1   :  { %v955_v30 = vmul.f32 2.1237322e-06, %v954_v28  ;;  %v966_v31 = vmul.f32 3.8918573e-05, %v954_v28 }
 0x8e3   :  { %v956_v32 = vadd.f32 0.00028619796, %v955_v30  ;;  %v967_v23 = vadd.f32 0.001143296, %v966_v31 }
 0x8e5   :  { %v957_v33 = vmul.f32 %v956_v32, %v954_v28  ;;  %v968_v3 = vmul.f32 %v967_v23, %v954_v28 }
 0x8e7   :  { %v969_v4 = vadd.f32 0.014752088, %v968_v3  ;;  %v958_v35 = vadd.f32 0.0036580483, %v957_v33 }
 0x8e9   :  { %v970_v37 = vmul.f32 %v969_v4, %v954_v28  ;;  %v959_v41 = vmul.f32 %v958_v35, %v954_v28 }
 0x8eb   :  { %v971_v38 = vadd.f32 0.112945676, %v970_v37  ;;  %v960_v47 = vadd.f32 0.05243302, %v959_v41 }
 0x8ed   :  { %v972_v44 = vmul.f32 %v971_v38, %v954_v28  ;;  %v961_v49 = vmul.f32 %v960_v47, %v954_v28 }
 0x8ef   :  { %v973_v46 = vadd.f32 0.4994258, %v972_v44  ;;  %v962_v45 = vadd.f32 0.18741608, %v961_v49 }
 0x8f1   :  { %v974_v0 = vmul.f32 %v973_v46, %v954_v28  ;;  %v963_v51 = vmul.f32 %v962_v45, %v954_v28 }
 0x8f3   :  { %v975_v48 = vadd.f32 1.0, %v974_v0  ;;  %v964_v20 = vadd.f32 1.1283791, %v963_v51 }
 0x8f5   :  { %1238 = vrcp.f32 %v975_v48  ;;  %v987_v1 = vand.u32 2147483648, %v975_v48  ;;  %v985_v54 = vand.u32 2147483647, %v975_v48  ;;  %vm981_vm3 = vweird.f32 %v975_v48 }
 0x8f6   :  { %v965_v52 = vmul.f32 %v964_v20, %v951_v26 }
 0x8f7   :  { %v988_v57 = vor.u32 1.1754944e-38, %v987_v1  ;;  %vm986_vm5 = vcmp.eq.f32.partialorder %v985_v54, 8.507059e+37 }
 0x8fb   :  { %v1239_v34 = vpop.eup %1238 }
 0x8fc   :  { %v977_v53 = vmul.f32 %v1239_v34, %v975_v48  ;;  %vm982_vm2 = vweird.f32 %v1239_v34 }
 0x8fd   :  { %vm983_vm4 = vmor %vm981_vm3, %vm982_vm2 }
 0x8fe   :  { %v978_v5 = vsub.f32 1.0, %v977_v53  ;;  %v1633_v53 = vld [vmem:[#allocation6] sm:$0xff] }
 0x900   :  { %v979_v2 = vmul.f32 %v1239_v34, %v978_v5  ;;  %v1037_v5 = vperm.slane %v1633_v53, 5 }
 0x902   :  { %v980_v55 = vadd.f32 %v1239_v34, %v979_v2 }
 0x904   :  { %v984_v10 = vsel %vm983_vm4, %v1239_v34, %v980_v55  ;;  %v448_v55 = vpop.permute.xlu1 %447 }
 0x905   :  { %v989_v56 = vsel %vm986_vm5, %v988_v57, %v984_v10  ;;  %v456_v57 = vsel %vm113_vm1, %v1432_v36, %v448_v55 }
 0x906   :  { %v990_v59 = vmul.f32 %v989_v56, %v965_v52  ;;  %v451_v52 = vpop.permute.xlu2 %450  ;;  %v454_v56 = vpop.permute.xlu0 %453 }
 0x907   :  { %v457_v10 = vsel %vm443_vm6, %v456_v57, %v451_v52 }
 0x908   :  { %v1162_v60 = vclamps-f32 %v990_v59, 1.0  ;;  %v458_v59 = vsel %vm445_vm7, %v457_v10, %v454_v56 }
 0x90a   :  { %v1033_v61 = vadd.f32 1.0, %v1162_v60 }
 0x90c   :  { %v1035_v62 = vmul.f32 %v1033_v61, %v942_v15 }
 0x90e   :  { %1054 = vmatmul.f32.vlgmr.msra.gmra.mxu2 %v1035_v62 }
 0x92e   :  { %v939_v63 = vpop.f32.mrf.mxu0 }
 0x92f   :  { %v940_v8 = vadd.f32 %v939_v63, %v912_v19 }
 0x931   :  { %v952_v9 = vmul.f32 %v950_v22, %v940_v8  ;;  %v943_v45 = vmul.f32 0.5, %v940_v8 }
 0x933   :  { %v993_v11 = vmul.f32 %v952_v9, %v952_v9 }
 0x935   :  { %v994_v13 = vmin.f32 %v993_v11, 16.0 }
 0x937   :  { %v995_v39 = vmul.f32 2.1237322e-06, %v994_v13  ;;  %v1006_v14 = vmul.f32 3.8918573e-05, %v994_v13 }
 0x939   :  { %v996_v16 = vadd.f32 0.00028619796, %v995_v39  ;;  %v1007_v17 = vadd.f32 0.001143296, %v1006_v14 }
 0x93b   :  { %v997_v18 = vmul.f32 %v996_v16, %v994_v13  ;;  %v1008_v21 = vmul.f32 %v1007_v17, %v994_v13  ;;  %v799_v16 = vpop.permute.xlu1 %798 }
 0x93d   :  { %v1009_v26 = vadd.f32 0.014752088, %v1008_v21  ;;  %v998_v27 = vadd.f32 0.0036580483, %v997_v18 }
 0x93f   :  { %v1010_v28 = vmul.f32 %v1009_v26, %v994_v13  ;;  %v999_v30 = vmul.f32 %v998_v27, %v994_v13 }
 0x941   :  { %v1011_v29 = vadd.f32 0.112945676, %v1010_v28  ;;  %v1000_v32 = vadd.f32 0.05243302, %v999_v30 }
 0x943   :  { %v1012_v24 = vmul.f32 %v1011_v29, %v994_v13  ;;  %v1001_v19 = vmul.f32 %v1000_v32, %v994_v13 }
 0x945   :  { %v1013_v31 = vadd.f32 0.4994258, %v1012_v24  ;;  %v1002_v22 = vadd.f32 0.18741608, %v1001_v19  ;;  %v1110_v19 = vperm.slane %v1633_v53, 7 }
 0x947   :  { %v1014_v23 = vmul.f32 %v1013_v31, %v994_v13  ;;  %v1003_v3 = vmul.f32 %v1002_v22, %v994_v13 }
 0x949   :  { %v1015_v43 = vadd.f32 1.0, %v1014_v23  ;;  %v1004_v37 = vadd.f32 1.1283791, %v1003_v3 }
 0x94b   :  { %1240 = vrcp.f32 %v1015_v43  ;;  %v1027_v7 = vand.u32 2147483648, %v1015_v43  ;;  %v1025_v41 = vand.u32 2147483647, %v1015_v43  ;;  %vm1021_vm9 = vweird.f32 %v1015_v43 }
 0x94c   :  { %v1005_v46 = vmul.f32 %v1004_v37, %v952_v9 }
 0x94d   :  { %v1028_v44 = vor.u32 1.1754944e-38, %v1027_v7  ;;  %vm1026_vm11 = vcmp.eq.f32.partialorder %v1025_v41, 8.507059e+37 }
 0x951   :  { %v1241_v33 = vpop.eup %1240 }
 0x952   :  { %v1017_v4 = vmul.f32 %v1241_v33, %v1015_v43  ;;  %vm1022_vm8 = vweird.f32 %v1241_v33 }
 0x953   :  { %vm1023_vm10 = vmor %vm1021_vm9, %vm1022_vm8 }
 0x954   :  { %v1018_v35 = vsub.f32 1.0, %v1017_v4 }
 0x956   :  { %v1019_v38 = vmul.f32 %v1241_v33, %v1018_v35 }
 0x958   :  { %v1020_v40 = vadd.f32 %v1241_v33, %v1019_v38 }
 0x95a   :  { %v1024_v47 = vsel %vm1023_vm10, %v1241_v33, %v1020_v40 }
 0x95b   :  { %v1029_v0 = vsel %vm1026_vm11, %v1028_v44, %v1024_v47 }
 0x95c   :  { %v1030_v48 = vmul.f32 %v1029_v0, %v1005_v46 }
 0x95e   :  { %v1163_v49 = vclamps-f32 %v1030_v48, 1.0 }
 0x960   :  { %v1034_v34 = vadd.f32 1.0, %v1163_v49 }
 0x962   :  { %v1036_v51 = vmul.f32 %v1034_v34, %v943_v45 }
 0x964   :  { %1057 = vmatmul.f32.gmra.mxu2 %v1036_v51 }
 0x991   :  { %v1055_v1 = vpop.f32.mrf.mxu2 }
 0x992   :  { %v1056_v20 = vadd.f32 %v1055_v1, %v1037_v5 }
 0x994   :  { %v1061_v2 = vadd.f32 %v1056_v20, %v1623_v58 }
 0x996   :  { %v1063_v54 = vsel %vm78_vm0, %v1061_v2, 0.0 }
 0x997   :  { %1064 = vadd.xlane.f32.xlu2 %v1063_v54 }
 0x9af   :  { %801 = vrot.lane.b32.xlu2 %v1568_v42, %s1325_s24 }
 0x9b7   :  { %1115 = vrot.lane.b32.xlu2 %v458_v59, %s1341_s19 }
 0x9e7   :  { %v1058_v60 = vpop.f32.mrf.mxu2 }
 0x9e8   :  { %v1059_v58 = vadd.f32 %v1058_v60, %v1037_v5 }
 0x9ea   :  { %v1062_v15 = vadd.f32 %v1059_v58, %v1628_v12 }
 0x9ec   :  { %v1066_v61 = vsel %vm78_vm0, %v1062_v15, 0.0 }
 0x9ed   :  { %1067 = vadd.xlane.f32.xlu0 %v1066_v61 }
 0xa01   :  { %795 = vrot.lane.b32.xlu0 %v1554_v25, %s1328_s28 }
 0xa0a   :  { %v1065_v42 = vpop.xlane.xlu2 %1064 }
 0xa0b   :  { %v1069_v36 = vmul.f32 %v1065_v42, %v1608_v6 }
 0xa0d   :  { %v1071_v62 = vsub.f32 %v1061_v2, %v1069_v36 }
 0xa0f   :  { %v1073_v63 = vmul.f32 %v1071_v62, %v1071_v62 }
 0xa11   :  { %v1075_v8 = vsel %vm78_vm0, %v1073_v63, 0.0 }
 0xa12   :  { %v802_v17 = vpop.permute.xlu2 %801 }
 0xa1a   :  { %v1116_v4 = vpop.permute.xlu2 %1115 }
 0xa2b   :  { %1076 = vadd.xlane.f32.xlu0 %v1075_v8 }
 0xa60   :  { %v1068_v9 = vpop.xlane.xlu0 %1067 }
 0xa61   :  { %v1070_v11 = vmul.f32 %v1068_v9, %v1608_v6 }
 0xa63   :  { %v1072_v13 = vsub.f32 %v1062_v15, %v1070_v11 }
 0xa65   :  { %v1074_v39 = vmul.f32 %v1072_v13, %v1072_v13 }
 0xa67   :  { %v1078_v12 = vsel %vm78_vm0, %v1074_v39, 0.0 }
 0xa68   :  { %1079 = vadd.xlane.f32.xlu1 %v1078_v12 }
 0xa73   :  { %v796_v14 = vpop.permute.xlu0 %795 }
 0xa74   :  { %v804_v25 = vsel %vm113_vm1, %v1576_v50, %v796_v14  ;;  %v1107_v50 = vperm.slane %v1633_v53, 6 }
 0xa75   :  { %v805_v18 = vsel %vm443_vm6, %v804_v25, %v799_v16 }
 0xa76   :  { %v806_v21 = vsel %vm445_vm7, %v805_v18, %v802_v17  ;;  %vm1123_vm7 = vcmask 523264  }
 0xa77   :  { %1117 = vrot.lane.b32.xlu2 %v806_v21, %s1341_s19 }
 0xa9e   :  { %v1077_v26 = vpop.xlane.xlu0 %1076 }
 0xa9f   :  { %v1081_v27 = vmul.f32 %v1077_v26, %v1608_v6 }
 0xaa1   :  { %v1083_v28 = vadd.f32 1e-12, %v1081_v27 }
 0xaa3   :  { %1242 = vrsqrt.f32 %v1083_v28  ;;  %vm1091_vm1 = vweird.f32 %v1083_v28 }
 0xaa9   :  { %v1243_v29 = vpop.eup %1242 }
 0xaaa   :  { %v1086_v30 = vmul.f32 %v1243_v29, %v1083_v28  ;;  %vm1092_vm12 = vweird.f32 %v1243_v29 }
 0xaab   :  { %vm1093_vm6 = vmor %vm1091_vm1, %vm1092_vm12 }
 0xaac   :  { %v1087_v24 = vmul.f32 %v1243_v29, %v1086_v30 }
 0xaae   :  { %v1088_v31 = vmul.f32 0.5, %v1087_v24 }
 0xab0   :  { %v1089_v32 = vsub.f32 1.5, %v1088_v31 }
 0xab2   :  { %v1090_v23 = vmul.f32 %v1243_v29, %v1089_v32 }
 0xab4   :  { %v1094_v43 = vsel %vm1093_vm6, %v1243_v29, %v1090_v23 }
 0xab5   :  { %v1105_v22 = vmul.f32 %v1094_v43, %v1071_v62 }
 0xab7   :  { %v1108_v33 = vmul.f32 %v1107_v50, %v1105_v22 }
 0xab9   :  { %v1111_v3 = vadd.f32 %v1110_v19, %v1108_v33 }
 0xabb   :  { %v1121_v35 = vsel %vm78_vm0, %v1111_v3, %v1116_v4 }
 0xabc   :  { %1124 = vst.msk [vmem:[%s1676_s4] sm:$0xff] %vm1123_vm7, %v1121_v35 }
 0xad1   :  { %v1118_v51 = vpop.permute.xlu2 %1117 }
 0xadb   :  { %v1080_v7 = vpop.xlane.xlu1 %1079 }
 0xadc   :  { %v1082_v37 = vmul.f32 %v1080_v7, %v1608_v6 }
 0xade   :  { %v1084_v38 = vadd.f32 1e-12, %v1082_v37 }
 0xae0   :  { %1244 = vrsqrt.f32 %v1084_v38  ;;  %vm1101_vm14 = vweird.f32 %v1084_v38 }
 0xae6   :  { %v1245_v41 = vpop.eup %1244 }
 0xae7   :  { %v1096_v40 = vmul.f32 %v1245_v41, %v1084_v38  ;;  %vm1102_vm13 = vweird.f32 %v1245_v41 }
 0xae8   :  { %vm1103_vm15 = vmor %vm1101_vm14, %vm1102_vm13 }
 0xae9   :  { %v1097_v44 = vmul.f32 %v1245_v41, %v1096_v40 }
 0xaeb   :  { %v1098_v46 = vmul.f32 0.5, %v1097_v44 }
 0xaed   :  { %v1099_v47 = vsub.f32 1.5, %v1098_v46 }
 0xaef   :  { %v1100_v0 = vmul.f32 %v1245_v41, %v1099_v47 }
 0xaf1   :  { %v1104_v48 = vsel %vm1103_vm15, %v1245_v41, %v1100_v0 }
 0xaf2   :  { %v1106_v49 = vmul.f32 %v1104_v48, %v1072_v13 }
 0xaf4   :  { %v1109_v45 = vmul.f32 %v1107_v50, %v1106_v49 }
 0xaf6   :  { %v1112_v34 = vadd.f32 %v1110_v19, %v1109_v45 }
 0xaf8   :  { %v1122_v53 = vsel %vm78_vm0, %v1112_v34, %v1118_v51 }
 0xaf9   :  { %1125 = vst.msk [vmem:[%s1676_s4 + $0x8] sm:$0xff] %vm1123_vm7, %v1122_v53 }
 0xafa   :  { %1130 = vsyncpa [#allocation3], 1 }
 0xafb   :  { %1131 = vsyncpa [#allocation5], 1 }

</bundles_post_ra>
